<compile_context>
chip_gen: v5e
topology: v5e:2x2
jax: 0.10.0
libtpu: 0.0.40
codegen_flags: <defaults>
</compile_context>

<pallas_src>
import functools

import jax
import jax.numpy as jnp
from jax.experimental import pallas as pl
from jax.experimental.pallas import tpu as pltpu


def _round_up(x, m):
    return ((x + m - 1) // m) * m


def _round128(x):
    return _round_up(x, 128)


# -----------------------------------------------------------------------------
# Kernel 1: fused GEMM  ->  relu(A @ W + bias)   (1x1 convs, stride-2 im2col)
# A, W and the output are bf16 (MXU operands); accumulation/bias/ReLU are f32.
# -----------------------------------------------------------------------------
def _gemm_bias_relu_kernel(a_ref, w_ref, b_ref, o_ref):
    acc = jnp.dot(a_ref[...], w_ref[...], preferred_element_type=jnp.float32)
    o_ref[...] = jnp.maximum(acc + b_ref[...], 0.0).astype(o_ref.dtype)


def gemm_bias_relu(a_bf16, w_mat, bias):
    """a_bf16: (M,K) bf16, w_mat: (K,Coutp) bf16, bias: (1,Coutp) f32 -> (M,Coutp) bf16."""
    m, k = a_bf16.shape
    coutp = w_mat.shape[1]
    tm = m if m <= 256 else 256
    mp = _round_up(m, tm)
    if mp != m:
        a_bf16 = jnp.pad(a_bf16, ((0, mp - m), (0, 0)))
    # 128-wide N tiles: matches the v5e MXU width, keeps the f32 accumulator
    # tile small, and yields extra grid blocks for megacore sharding on v7x.
    tn = 128
    out = pl.pallas_call(
        _gemm_bias_relu_kernel,
        out_shape=jax.ShapeDtypeStruct((mp, coutp), jnp.bfloat16),
        grid=(mp // tm, coutp // tn),
        in_specs=[
            pl.BlockSpec((tm, k), lambda i, j: (i, 0)),
            pl.BlockSpec((k, tn), lambda i, j: (0, j)),
            pl.BlockSpec((1, tn), lambda i, j: (0, j)),
        ],
        out_specs=pl.BlockSpec((tm, tn), lambda i, j: (i, j)),
        compiler_params=pltpu.CompilerParams(
            dimension_semantics=("parallel", "parallel")),
        cost_estimate=pl.CostEstimate(
            flops=2 * mp * k * coutp, transcendentals=0,
            bytes_accessed=mp * k * 2 + k * coutp * 2 + mp * coutp * 2),
    )(a_bf16, w_mat, bias)
    return out[:m] if mp != m else out


# -----------------------------------------------------------------------------
# Kernel 2: 3x3 stride-1 conv as an M-tiled, folded-K "shift GEMM".
# The zero-padded activation (flattened to rows (N*Hp*Wp, Cinp), bf16) stays in
# HBM; each grid step DMAs its (tm + halo)-row window into VMEM, builds the
# (tm, 9*Cinp) patch operand in-register from 9 static row-shifted slices
# (tap (dy,dx) == row offset dy*Wp+dx) and does ONE MXU matmul.
# Rows belonging to spatially-padded / out-of-image positions compute garbage
# and MUST only ever be consumed by the wrapper's final slice below.
# Optional fused residual (added post-ReLU, matching YOLOX ordering).
# -----------------------------------------------------------------------------
def _conv3x3_s1_kernel(*refs, wp, tm, halo, has_res):
    if has_res:
        x_hbm, w_ref, b_ref, r_ref, o_ref, xbuf, sem = refs
    else:
        x_hbm, w_ref, b_ref, o_ref, xbuf, sem = refs
    row0 = pl.multiple_of(pl.program_id(0) * tm, 8)
    cp = pltpu.make_async_copy(x_hbm.at[pl.ds(row0, tm + halo), :], xbuf, sem)
    cp.start()
    cp.wait()
    x = xbuf[...]                                           # (tm + halo, cinp) bf16
    # Fold the 9 taps into the contraction dim: one matmul with K = 9*cinp.
    patches = jnp.concatenate(
        [x[dy * wp + dx:dy * wp + dx + tm, :]
         for dy in range(3) for dx in range(3)],
        axis=-1)                                            # (tm, 9*cinp) bf16
    acc = jnp.dot(patches, w_ref[...], preferred_element_type=jnp.float32)
    y = jnp.maximum(acc + b_ref[...], 0.0)                  # folded-BN bias + ReLU (f32)
    if has_res:
        y = y + r_ref[...].astype(jnp.float32)              # fused residual (post-ReLU)
    o_ref[...] = y.astype(o_ref.dtype)


def conv3x3_s1(x, p, residual=None):
    """3x3 stride-1 conv (+folded BN+ReLU [+residual]).  x: (N,H,W,Cinp) bf16."""
    n, h, w, cinp = x.shape
    coutp = p["coutp"]
    hp = h + 2
    wp = _round_up(w + 2, 8)        # row pitch multiple of 8 -> dy*wp sublane-aligned
    m = n * hp * wp
    tm = m if m <= 256 else 256
    mp = _round_up(m, tm)
    halo = _round_up(2 * wp + 2, 8)
    xflat = jnp.pad(x, ((0, 0), (1, 1), (1, wp - w - 1), (0, 0))).reshape(m, cinp)
    xflat = jnp.pad(xflat, ((0, mp + halo - m), (0, 0)))
    inputs = [xflat, p["w"], p["bias"]]
    in_specs = [
        pl.BlockSpec(memory_space=pl.ANY),                  # stays in HBM, halo-DMA'd
        pl.BlockSpec((9 * cinp, coutp), lambda i: (0, 0)),
        pl.BlockSpec((1, coutp), lambda i: (0, 0)),
    ]
    has_res = residual is not None
    if has_res:
        r = jnp.pad(residual,
                    ((0, 0), (0, hp - h), (0, wp - w), (0, 0))).reshape(m, coutp)
        if mp != m:
            r = jnp.pad(r, ((0, mp - m), (0, 0)))
        inputs.append(r)
        in_specs.append(pl.BlockSpec((tm, coutp), lambda i: (i, 0)))
    out = pl.pallas_call(
        functools.partial(_conv3x3_s1_kernel, wp=wp, tm=tm, halo=halo,
                          has_res=has_res),
        out_shape=jax.ShapeDtypeStruct((mp, coutp), jnp.bfloat16),
        grid=(mp // tm,),
        in_specs=in_specs,
        out_specs=pl.BlockSpec((tm, coutp), lambda i: (i, 0)),
        scratch_shapes=[pltpu.VMEM((tm + halo, cinp), jnp.bfloat16),
                        pltpu.SemaphoreType.DMA(())],
        compiler_params=pltpu.CompilerParams(dimension_semantics=("parallel",)),
        cost_estimate=pl.CostEstimate(
            flops=2 * 9 * mp * cinp * coutp, transcendentals=0,
            bytes_accessed=(mp + halo) * cinp * 2 + 9 * cinp * coutp * 2
            + mp * coutp * 2 + (mp * coutp * 2 if has_res else 0)),
    )(*inputs)
    out = out[:m] if mp != m else out
    # Discard rows of spatially-padded / out-of-image positions (garbage rows).
    return out.reshape(n, hp, wp, coutp)[:, :h, :w, :]


# -----------------------------------------------------------------------------
# Kernel 3: fused SPP 5/9/13 max-pools -> writes [x, p5, p9, p13] channel slabs
# directly into lane-aligned slices of the output (no in-kernel concat);
# each 5x5 max is separable (1x5 then 5x1); grid over batch for megacore.
# -----------------------------------------------------------------------------
def _spp_pool_kernel(x_ref, o_ref):
    x = x_ref[...]                                          # (1, h+12, w+12, c), -inf spatial pad
    h, w = o_ref.shape[1], o_ref.shape[2]
    c = x.shape[-1]

    def max5(a):                                            # separable 5x5 max
        ah = functools.reduce(
            jnp.maximum, [a[:, d:d + a.shape[1] - 4, :, :] for d in range(5)])
        return functools.reduce(
            jnp.maximum, [ah[:, :, d:d + ah.shape[2] - 4, :] for d in range(5)])

    p5 = max5(x)                                            # (1, h+8, w+8, c)
    p9 = max5(p5)                                           # (1, h+4, w+4, c)
    p13 = max5(p9)                                          # (1, h,   w,   c)
    o_ref[:, :, :, 0 * c:1 * c] = x[:, 6:6 + h, 6:6 + w, :]
    o_ref[:, :, :, 1 * c:2 * c] = p5[:, 4:4 + h, 4:4 + w, :]
    o_ref[:, :, :, 2 * c:3 * c] = p9[:, 2:2 + h, 2:2 + w, :]
    o_ref[:, :, :, 3 * c:4 * c] = p13


def spp_pools(x):
    n, h, w_, c = x.shape
    xp = jnp.pad(x, ((0, 0), (6, 6), (6, 6), (0, 0)), constant_values=-jnp.inf)
    return pl.pallas_call(
        _spp_pool_kernel,
        out_shape=jax.ShapeDtypeStruct((n, h, w_, 4 * c), jnp.bfloat16),
        grid=(n,),
        in_specs=[pl.BlockSpec((1, h + 12, w_ + 12, c), lambda i: (i, 0, 0, 0))],
        out_specs=pl.BlockSpec((1, h, w_, 4 * c), lambda i: (i, 0, 0, 0)),
        compiler_params=pltpu.CompilerParams(dimension_semantics=("parallel",)),
    )(xp)


# -----------------------------------------------------------------------------
# Conv wrappers (activations NHWC bf16, channel-padded to 128-lane multiples)
# -----------------------------------------------------------------------------
def conv1x1(x, p):
    n, h, w, cinp = x.shape
    a = x.reshape(n * h * w, cinp)
    y = gemm_bias_relu(a, p["w"], p["bias"])
    return y.reshape(n, h, w, p["coutp"])


def conv3x3_s2(x, p):
    # TODO(synk): im2col still built wrapper-side for these 4 downsample convs
    # (real channels only, bf16); in-kernel stride-2 taps would cut its HBM read.
    n, h, w, _ = x.shape
    cin = p["cin_real"]
    hout, wout = h // 2, w // 2
    xp = jnp.pad(x[..., :cin], ((0, 0), (1, 1), (1, 1), (0, 0)))
    cols = [xp[:, dy:dy + 2 * hout:2, dx:dx + 2 * wout:2, :]
            for dy in range(3) for dx in range(3)]
    a = jnp.concatenate(cols, axis=-1).reshape(n * hout * wout, 9 * cin)
    kp = p["w"].shape[0]
    if kp != 9 * cin:
        a = jnp.pad(a, ((0, 0), (0, kp - 9 * cin)))
    y = gemm_bias_relu(a, p["w"], p["bias"])
    return y.reshape(n, hout, wout, p["coutp"])


# -----------------------------------------------------------------------------
# YOLOX building blocks (forward), operating on channel-padded NHWC bf16
# -----------------------------------------------------------------------------
def bottleneck_fwd(x, p, shortcut):
    y = conv1x1(x, p["conv1"])
    # residual add (post-ReLU) is fused into conv2's kernel epilogue
    return conv3x3_s1(y, p["conv2"], residual=x if shortcut else None)


def csplayer_fwd(x, p, shortcut):
    n, h, w, cinp = x.shape
    hidp = p["hidp"]
    # conv1 + conv2 fused into one GEMM (weights concatenated along N at init)
    y = gemm_bias_relu(x.reshape(n * h * w, cinp),
                       p["conv12"]["w"], p["conv12"]["bias"])
    y = y.reshape(n, h, w, 2 * hidp)
    x1, x2 = y[..., :hidp], y[..., hidp:]
    for bp in p["m"]:
        x1 = bottleneck_fwd(x1, bp, shortcut)
    return conv1x1(jnp.concatenate([x1, x2], axis=-1), p["conv3"])


def spp_fwd(x, p):
    x = conv1x1(x, p["conv1"])
    pooled = spp_pools(x)                       # fused [x, max5, max9, max13]
    return conv1x1(pooled, p["conv2"])


# -----------------------------------------------------------------------------
# Deterministic parameter construction: BN folded into conv weights (eval mode),
# weights scattered to the padded input-channel layout, padded to 128-lane
# output multiples and cast to bf16 ONCE here.
# -----------------------------------------------------------------------------
class ParamGen:
    def __init__(self, seed):
        self.key = jax.random.PRNGKey(seed)

    def next(self):
        self.key, sub = jax.random.split(self.key)
        return sub


def _fold_bn(pg, w, cout):
    gamma = jax.random.uniform(pg.next(), (cout,), jnp.float32, 0.8, 1.2)
    beta = 0.05 * jax.random.normal(pg.next(), (cout,), jnp.float32)
    mean = 0.05 * jax.random.normal(pg.next(), (cout,), jnp.float32)
    var = jax.random.uniform(pg.next(), (cout,), jnp.float32, 0.9, 1.1)
    scale = gamma / jnp.sqrt(var + 1e-5)
    return w * scale, beta - mean * scale


def _scatter_rows(wm, segments):
    """Scatter (cin_real_total, coutp) rows into the padded input-channel layout."""
    kp = sum(padded for _, padded in segments)
    out = jnp.zeros((kp, wm.shape[1]), wm.dtype)
    r0 = k0 = 0
    for real, padded in segments:
        out = out.at[k0:k0 + real].set(wm[r0:r0 + real])
        r0 += real
        k0 += padded
    return out


def init_baseconv(pg, cin, cout, k, stride=1, in_segments=None):
    if in_segments is None:
        in_segments = [(cin, _round128(cin))]
    fan_in = k * k * cin
    w = jax.random.normal(pg.next(), (k, k, cin, cout), jnp.float32) / jnp.sqrt(fan_in)
    w, bias = _fold_bn(pg, w, cout)
    coutp = _round128(cout)
    p = {"cin_real": cin, "cout": cout, "coutp": coutp,
         "bias": jnp.zeros((1, coutp), jnp.float32).at[0, :cout].set(bias)}
    if k == 1:
        wm = jnp.zeros((cin, coutp), jnp.float32).at[:, :cout].set(
            w.reshape(cin, cout))
        p["w"] = _scatter_rows(wm, in_segments).astype(jnp.bfloat16)
    elif stride == 1:                            # 3x3 s1: folded 9-tap K layout
        taps = []
        wt9 = w.reshape(9, cin, cout)
        for t in range(9):
            wt = jnp.zeros((cin, coutp), jnp.float32).at[:, :cout].set(wt9[t])
            taps.append(_scatter_rows(wt, in_segments))
        p["w"] = jnp.concatenate(taps, axis=0).astype(jnp.bfloat16)
    else:                                        # 3x3 s2: im2col GEMM weights
        kreal = 9 * cin
        kp = _round128(kreal)
        p["w"] = (jnp.zeros((kp, coutp), jnp.float32)
                  .at[:kreal, :cout].set(w.reshape(kreal, cout))
                  .astype(jnp.bfloat16))
    return p


def init_csp_conv12(pg, cin, hidden, in_segments):
    c1 = init_baseconv(pg, cin, hidden, 1, in_segments=in_segments)
    c2 = init_baseconv(pg, cin, hidden, 1, in_segments=in_segments)
    return {"w": jnp.concatenate([c1["w"], c2["w"]], axis=1),
            "bias": jnp.concatenate([c1["bias"], c2["bias"]], axis=1)}


def init_bottleneck(pg, cin, cout):
    hidden = int(cout * 1.0)
    seg = [(cin, _round128(cin))]
    return {"conv1": init_baseconv(pg, cin, hidden, 1, in_segments=seg),
            "conv2": init_baseconv(pg, hidden, cout, 3, stride=1,
                                   in_segments=[(hidden, _round128(hidden))])}


def init_csplayer(pg, cin, cout, n):
    hidden = int(cout * 0.5)
    hidp = _round128(hidden)
    seg = [(cin, _round128(cin))]
    return {"hidp": hidp,
            "conv12": init_csp_conv12(pg, cin, hidden, seg),
            "conv3": init_baseconv(pg, 2 * hidden, cout, 1,
                                   in_segments=[(hidden, hidp), (hidden, hidp)]),
            "m": [init_bottleneck(pg, hidden, hidden) for _ in range(n)]}


def init_spp(pg, cin, cout):
    hidden = cin // 2
    hidp = _round128(hidden)
    return {"conv1": init_baseconv(pg, cin, hidden, 1),
            "conv2": init_baseconv(pg, hidden * 4, cout, 1,
                                   in_segments=[(hidden, hidp)] * 4)}


def init_cspdarknet(seed, dep_mul, wid_mul,
                    feat_channels=(128, 256, 512, 1024), input_channel=3):
    pg = ParamGen(seed)
    base_depth = max(round(dep_mul * 3), 1)
    params = {}
    in_ch, out_ch = input_channel, int(wid_mul * 64)
    params["stem"] = {"conv": init_baseconv(pg, in_ch * 4, out_ch, 3, stride=1)}
    in_ch, out_ch = out_ch, int(wid_mul * feat_channels[0])
    params["dark2"] = {"conv": init_baseconv(pg, in_ch, out_ch, 3, stride=2),
                       "csp": init_csplayer(pg, out_ch, out_ch, base_depth)}
    in_ch, out_ch = out_ch, int(wid_mul * feat_channels[1])
    params["dark3"] = {"conv": init_baseconv(pg, in_ch, out_ch, 3, stride=2),
                       "csp": init_csplayer(pg, out_ch, out_ch, base_depth * 3)}
    in_ch, out_ch = out_ch, int(wid_mul * feat_channels[2])
    params["dark4"] = {"conv": init_baseconv(pg, in_ch, out_ch, 3, stride=2),
                       "csp": init_csplayer(pg, out_ch, out_ch, base_depth * 3)}
    in_ch, out_ch = out_ch, int(wid_mul * feat_channels[3])
    params["dark5"] = {"conv": init_baseconv(pg, in_ch, out_ch, 3, stride=2),
                       "spp": init_spp(pg, out_ch, out_ch),
                       "csp": init_csplayer(pg, out_ch, out_ch, base_depth)}
    return params


# -----------------------------------------------------------------------------
# CSPDarknet forward (out_idxes = (1, 2, 3) -> returns dark3, dark4, dark5)
# -----------------------------------------------------------------------------
def cspdarknet_forward(x_nchw, params, out_idxes=(1, 2, 3)):
    out_names_all = ("dark2", "dark3", "dark4", "dark5")
    out_names = [out_names_all[i] for i in out_idxes]
    last_layer = max(out_idxes)

    x = jnp.transpose(x_nchw, (0, 2, 3, 1))          # NCHW -> NHWC
    # Focus: space-to-depth (same channel order as torch.cat(dim=1)), then stem conv.
    tl = x[:, ::2, ::2, :]
    bl = x[:, 1::2, ::2, :]
    tr = x[:, ::2, 1::2, :]
    br = x[:, 1::2, 1::2, :]
    x4 = jnp.concatenate([tl, bl, tr, br], axis=-1).astype(jnp.bfloat16)
    cinp = _round128(x4.shape[-1])
    x4 = jnp.pad(x4, ((0, 0), (0, 0), (0, 0), (0, cinp - x4.shape[-1])))
    x = conv3x3_s1(x4, params["stem"]["conv"])

    outputs = {}
    x = conv3x3_s2(x, params["dark2"]["conv"])
    x = csplayer_fwd(x, params["dark2"]["csp"], shortcut=True)
    outputs["dark2"] = (x, params["dark2"]["csp"]["conv3"]["cout"])
    if last_layer >= 1:
        x = conv3x3_s2(x, params["dark3"]["conv"])
        x = csplayer_fwd(x, params["dark3"]["csp"], shortcut=True)
        outputs["dark3"] = (x, params["dark3"]["csp"]["conv3"]["cout"])
    if last_layer >= 2:
        x = conv3x3_s2(x, params["dark4"]["conv"])
        x = csplayer_fwd(x, params["dark4"]["csp"], shortcut=True)
        outputs["dark4"] = (x, params["dark4"]["csp"]["conv3"]["cout"])
    if last_layer >= 3:
        x = conv3x3_s2(x, params["dark5"]["conv"])
        x = spp_fwd(x, params["dark5"]["spp"])
        x = csplayer_fwd(x, params["dark5"]["csp"], shortcut=False)
        outputs["dark5"] = (x, params["dark5"]["csp"]["conv3"]["cout"])

    feats = []
    for name in out_names:
        a, c = outputs[name]
        feats.append(jnp.transpose(a[..., :c], (0, 3, 1, 2)).astype(jnp.float32))
    return feats


# -----------------------------------------------------------------------------
# Main
# -----------------------------------------------------------------------------
if __name__ == "__main__":
    dep_mul, wid_mul = 0.33, 0.25   # base_depth=1; channels 16/32/64/128/256
    params = init_cspdarknet(seed=42, dep_mul=dep_mul, wid_mul=wid_mul)

    key = jax.random.PRNGKey(0)
    x = jax.random.normal(key, (2, 3, 64, 64), jnp.float32)   # NCHW input

    feats = cspdarknet_forward(x, params, out_idxes=(1, 2, 3))
    feats = [jax.block_until_ready(f) for f in feats]

    expected = [(2, 64, 8, 8), (2, 128, 4, 4), (2, 256, 2, 2)]
    for f, shp in zip(feats, expected):
        assert f.shape == shp, (f.shape, shp)
        assert bool(jnp.all(jnp.isfinite(f)))

    print("KERNEL_OK")
</pallas_src>

<mosaic_0001>
module attributes {stable_mosaic.version = 11 : i64} {
  func.func @_conv3x3_s1_kernel(%arg0: i32, %arg1: memref<2904x128xbf16, #tpu.memory_space<any>>, %arg2: memref<1152x128xbf16, #tpu.memory_space<vmem>>, %arg3: memref<1x128xf32, #tpu.memory_space<vmem>>, %arg4: memref<256x128xbf16, #tpu.memory_space<vmem>>, %arg5: memref<344x128xbf16, #tpu.memory_space<vmem>>, %arg6: memref<!tpu.dma_semaphore, #tpu.memory_space<semaphore_mem>>) attributes {dimension_semantics = [#tpu.dimension_semantics<parallel>], iteration_bounds = array<i64: 11>, scalar_prefetch = 0 : i64, scratch_operands = 2 : i64, tpu.core_type = #tpu.core_type<tc>, window_params = [{}, {pipeline_mode = #tpu.pipeline_mode<synchronous>, transform_indices = @transform_1, window_bounds = array<i64: 1152, 128>}, {pipeline_mode = #tpu.pipeline_mode<synchronous>, transform_indices = @transform_2, window_bounds = array<i64: 1, 128>}, {transform_indices = @transform_3, window_bounds = array<i64: 256, 128>}]} {
    %c256_i32 = arith.constant 256 : i32
    %0 = arith.muli %arg0, %c256_i32 : i32
    %1 = tpu.assume_multiple %0, 8 : i32
    %c0_i32 = arith.constant 0 : i32
    %2 = tpu.memref_slice %arg1[%1, %c0_i32] : memref<2904x128xbf16, #tpu.memory_space<any>> -> memref<344x128xbf16, #tpu.memory_space<any>>
    tpu.enqueue_dma source(%2 : memref<344x128xbf16, #tpu.memory_space<any>>) target(%arg5 : memref<344x128xbf16, #tpu.memory_space<vmem>>) target_semaphore(%arg6 : memref<!tpu.dma_semaphore, #tpu.memory_space<semaphore_mem>>)
    %c0_i32_0 = arith.constant 0 : i32
    %3 = tpu.memref_slice %arg1[%1, %c0_i32_0] : memref<2904x128xbf16, #tpu.memory_space<any>> -> memref<344x128xbf16, #tpu.memory_space<any>>
    tpu.wait_dma2 semaphore(%arg6 : memref<!tpu.dma_semaphore, #tpu.memory_space<semaphore_mem>>) src(%3 : memref<344x128xbf16, #tpu.memory_space<any>>) dst(%arg5 : memref<344x128xbf16, #tpu.memory_space<vmem>>)
    %c0 = arith.constant 0 : index
    %c0_1 = arith.constant 0 : index
    %4 = vector.load %arg5[%c0, %c0_1] : memref<344x128xbf16, #tpu.memory_space<vmem>>, vector<344x128xbf16>
    %5 = vector.extract_strided_slice %4 {offsets = [0, 0], sizes = [256, 128], strides = [1, 1]} : vector<344x128xbf16> to vector<256x128xbf16>
    %6 = vector.extract_strided_slice %4 {offsets = [1, 0], sizes = [256, 128], strides = [1, 1]} : vector<344x128xbf16> to vector<256x128xbf16>
    %7 = vector.extract_strided_slice %4 {offsets = [2, 0], sizes = [256, 128], strides = [1, 1]} : vector<344x128xbf16> to vector<256x128xbf16>
    %8 = vector.extract_strided_slice %4 {offsets = [40, 0], sizes = [256, 128], strides = [1, 1]} : vector<344x128xbf16> to vector<256x128xbf16>
    %9 = vector.extract_strided_slice %4 {offsets = [41, 0], sizes = [256, 128], strides = [1, 1]} : vector<344x128xbf16> to vector<256x128xbf16>
    %10 = vector.extract_strided_slice %4 {offsets = [42, 0], sizes = [256, 128], strides = [1, 1]} : vector<344x128xbf16> to vector<256x128xbf16>
    %11 = vector.extract_strided_slice %4 {offsets = [80, 0], sizes = [256, 128], strides = [1, 1]} : vector<344x128xbf16> to vector<256x128xbf16>
    %12 = vector.extract_strided_slice %4 {offsets = [81, 0], sizes = [256, 128], strides = [1, 1]} : vector<344x128xbf16> to vector<256x128xbf16>
    %13 = vector.extract_strided_slice %4 {offsets = [82, 0], sizes = [256, 128], strides = [1, 1]} : vector<344x128xbf16> to vector<256x128xbf16>
    %14 = tpu.concatenate %5, %6, %7, %8, %9, %10, %11, %12, %13 in 1 : vector<256x128xbf16>, vector<256x128xbf16>, vector<256x128xbf16>, vector<256x128xbf16>, vector<256x128xbf16>, vector<256x128xbf16>, vector<256x128xbf16>, vector<256x128xbf16>, vector<256x128xbf16> -> vector<256x1152xbf16>
    %c0_2 = arith.constant 0 : index
    %c0_3 = arith.constant 0 : index
    %15 = vector.load %arg2[%c0_2, %c0_3] : memref<1152x128xbf16, #tpu.memory_space<vmem>>, vector<1152x128xbf16>
    %cst = arith.constant dense<0.000000e+00> : vector<256x128xf32>
    %16 = tpu.matmul %14, %15, %cst {dimension_numbers = #tpu.dot_dimension_numbers<[1], [0], [0], [1], [0, 0, 1, 1], [], []>} : vector<256x1152xbf16>, vector<1152x128xbf16>, vector<256x128xf32> -> vector<256x128xf32>
    %c0_4 = arith.constant 0 : index
    %c0_5 = arith.constant 0 : index
    %17 = vector.load %arg3[%c0_4, %c0_5] : memref<1x128xf32, #tpu.memory_space<vmem>>, vector<1x128xf32>
    %18 = vector.broadcast %17 : vector<1x128xf32> to vector<256x128xf32>
    %19 = arith.addf %16, %18 : vector<256x128xf32>
    %cst_6 = arith.constant 0.000000e+00 : f32
    %20 = vector.broadcast %cst_6 : f32 to vector<256x128xf32>
    %21 = arith.maximumf %19, %20 : vector<256x128xf32>
    %22 = arith.truncf %21 : vector<256x128xf32> to vector<256x128xbf16>
    %c0_7 = arith.constant 0 : index
    %c0_8 = arith.constant 0 : index
    %23 = vector.load %arg4[%c0_7, %c0_8] : memref<256x128xbf16, #tpu.memory_space<vmem>>, vector<256x128xbf16>
    tpu.vector_store %arg4[%c0_7, %c0_8], %22 {strides = array<i32>} : memref<256x128xbf16, #tpu.memory_space<vmem>>, vector<256x128xbf16>,
    return
  }
  func.func @transform_1(%arg0: i32) -> (i32, i32) {
    %c0_i32 = arith.constant 0 : i32
    %c0_i32_0 = arith.constant 0 : i32
    %c0_i32_1 = arith.constant 0 : i32
    return %c0_i32, %c0_i32_0 : i32, i32
  }
  func.func @transform_2(%arg0: i32) -> (i32, i32) {
    %c0_i32 = arith.constant 0 : i32
    %c0_i32_0 = arith.constant 0 : i32
    %c0_i32_1 = arith.constant 0 : i32
    return %c0_i32, %c0_i32_0 : i32, i32
  }
  func.func @transform_3(%arg0: i32) -> (i32, i32) {
    %c0_i32 = arith.constant 0 : i32
    %c0_i32_0 = arith.constant 0 : i32
    return %arg0, %c0_i32 : i32, i32
  }
}

</mosaic_0001>

<bundles_post_ra>
// kernel: tpu_custom_call.1
= control target key start
LH: loop header
LB: loop body
LE: loop exit
PB: predicated region body
PF: predicated region fallthrough
CT: control target
= control target key end

     0   :  { %8 = vsyncpa [#allocation5], 0  ;;  %s4033_s0 = inlined_call_operand.hbm [shape: bf16[2904,128], index: 0, kind: input, shape index: {}]   ;;  %s4034_s1 = inlined_call_operand.hbm [shape: bf16[1152,128], index: 1, kind: input, shape index: {}]   ;;  %s4035_s2 = inlined_call_operand.vmem [shape: f32[1,128], index: 2, kind: input, shape index: {}]   ;;  %s4036_s3 = inlined_call_operand.hbm [shape: bf16[2816,128], index: 3, kind: output, shape index: {}]  }
   0x1   :  { %9 = vsyncpa [#allocation6], 0 }
   0x2   :  { %11 = vsyncpa [#allocation6 + $0x1], 0  ;;  %s3325_s12 = smov 0   ;;  %s3327_s13 = smov 0  }
   0x3   :  { %s3329_s14 = smov 0   ;;  %s3331_s15 = smov 0  }
   0x4 LB: > { %s3346_s16 = sadd.s32 4294967295, %s3297_s15   ;;  %s2397_s17 = sadd.s32 4294967294, %s3297_s15   ;;  %s3297_s15 = sphi %s3331_s15, %s4095_s15   ;;  %s3293_s14 = sphi %s3329_s14, %s4094_s14   ;;  %s3289_s13 = sphi %s3327_s13, %s4093_s13   ;;  %s3285_s12 = sphi %s3325_s12, %s4092_s12  }
   0x5   : > { %s3350_s18 = sadd.s32 1, %s3297_s15   ;;  %s66_s19 = sadd.s32 1, %s3293_s14 }
   0x6   : > { %s63_s20 = ssub.s32 %s3297_s15, %s3350_s18  ;;  %p76_p0 = scmp.ne.s32.totalorder %s3293_s14, %s3289_s13 }
   0x7   : > { %p64_p1 = scmp.eq.s32.totalorder %s63_s20, 0  ;;  %p77_p2 = scmp.eq.s32.totalorder %s3346_s16, 10 }
   0x8   : > { %p82_p3 = scmp.ne.s32.totalorder %s3289_s13, %s3285_s12  ;;  %p83_p4 = scmp.eq.s32.totalorder %s2397_s17, 10 }
   0x9   : > { %s3361_s21 = scalar_select %p64_p1, %s3293_s14, %s66_s19  }
   0xa   : > { %p3363_p5 = por %p77_p2, %p76_p0  ;;  %p3367_p6 = por %p83_p4, %p82_p3 }
   0xb   : > { %p2398_p7 = scmp.ge.s32.totalorder %s3297_s15, 1  ;;  %p90_p8 = scmp.lt.s32.totalorder %s3297_s15, 12 }
   0xc   : > { %p3115_p9 = scmp.eq.s32.totalorder %s3346_s16, 0  ;;  %s101_s26 = sshll.u32 %s4034_s1, 4  ;;  %s102_s26 = int_to_ptr.hbm [resolvable:$true] %s101_s26 }
   0xd   : > { %p91_p10 = pnand %p2398_p7, %p90_p8  ;;  %s3299_s27 = smov [#allocation4]  }
   0xe   : > { %s103_s28 = sshll.u32 %s3299_s27, 4  ;;  %s3300_s29 = smov 64   ;;  %s104_s28 = int_to_ptr.vmem [resolvable:$true] %s103_s28 }
   0xf   : > { %p3107_p11 = pneg %p91_p10  ;;  %s3301_s30 = smov 4  }
  0x10   : > { %122 = sbr.rel (%p91_p10) target bundleno = 785 (0x311), region = 28 }
  0x11   : > { %p3108_p12 = pnand %p3115_p9, %p3107_p11 }
  0x13   : > { %3110 = dma.hbm_to_vmem [thread:$0]  (!%p3108_p12), %s102_s26, 9216, %s104_s28, [#allocation5], %s3300_s29, %s3300_s29, %s3301_s30  }
  0x15   : > { %3274 = dma.done.wait (%p3115_p9), [#allocation5], 9216  }
  0x16   : > { %3276 = vsyncadd (%p3115_p9), [#allocation5], 4294958080  ;;  %s137_s4 = sand.u32 1, %s3289_s13   ;;  %s2403_s5 = sshll.u32 %s3346_s16, 8 }
  0x17   : > { %s2402_s6 = sshll.u32 %s137_s4, 7  ;;  %s142_s7 = sshra.s32 %s2403_s5, 3 }
  0x18   : > { %s2404_s8 = sshll.u32 %s142_s7, 2  ;;  %s3302_s19 = smov [#allocation2]  }
  0x19   : > { %s145_s11 = scalar_lea.hbm %s4033_s0, %s2404_s8  ;;  %s155_s20 = sshll.u32 %s3302_s19, 4  ;;  %s156_s20 = int_to_ptr.vmem [resolvable:$true] %s155_s20 }
  0x1a   : > { %s153_s17 = sshll.u32 %s145_s11, 4  ;;  %s3209_s28 = scalar_lea.hbm %s4033_s0, 1452  ;;  %s154_s17 = int_to_ptr.hbm [resolvable:$true] %s153_s17 }
  0x1b   : > { %s3205_s24 = sshra.s32 %s154_s17, 4  ;;  %s3206_s24 = int_to_ptr.hbm [resolvable:$true] %s3205_s24 }
  0x1c   : > { %s3207_s25 = scalar_lea.hbm %s3206_s24, 172  ;;  %p3210_p0 = scmp.lt.s32.totalorder %s3206_s24, %s4033_s0 }
  0x1d   : > { %p3208_p13 = scmp.ne.s32.totalorder %s3206_s24, %s3207_s25  ;;  %p3211_p1 = scmp.lt.s32.totalorder %s3209_s28, %s3207_s25 }
  0x1f   : > { %p3212_p2 = por %p3211_p1, %p3210_p0 }
  0x21   : > { %p3213_p3 = pnand %p3212_p2, %p3208_p13 }
  0x23   : > { %3216 = shalt.err (!%p3213_p3)  }
  0x24   : > { %158 = dma.hbm_to_vmem [thread:$0]  %s154_s17, 2752, %s156_s20, [#allocation3] }
  0x25   : > { %s3396_s5 = scalar_lea.vmem [#allocation7], %s2402_s6 }
  0x26   : > { %3277 = dma.done.wait [#allocation3], 2752 }
  0x27   : > { %3278 = vsyncadd [#allocation3], 4294964544  ;;  %v2726_v0 = vld [vmem:[#allocation4 + $0x38] sm:$0xff]  ;;  %v2725_v1 = vld [vmem:[#allocation4 + $0x30] sm:$0xff]  ;;  %vm305_vm0 = vsmask.f32 7424 }
  0x28   : > { %3073 = vmatpush.bf16.msra.mxu1 %v2726_v0  ;;  %3074 = vmatpush.bf16.msra.mxu2 %v2726_v0  ;;  %v2724_v2 = vld [vmem:[#allocation4 + $0x28] sm:$0xff]  ;;  %v2723_v3 = vld [vmem:[#allocation4 + $0x20] sm:$0xff]  ;;  %v2722_v4 = vld [vmem:[#allocation4 + $0x18] sm:$0xff]  ;;  %vm454_vm1 = vcmask 1046528   ;;  %s2791_s8 = sshll.u32 %s3346_s16, 7  ;;  %s2324_s17 = sshll.u32 %s3396_s5, 4  ;;  %s2325_s17 = int_to_ptr.vmem [resolvable:$true] %s2324_s17 }
  0x29   : > { %3075 = vmatpush.bf16.msra.mxu3 %v2726_v0  ;;  %1414 = vmatpush.bf16.msra.mxu0 %v2726_v0  ;;  %v2721_v5 = vld [vmem:[#allocation4 + $0x10] sm:$0xff]  ;;  %v2720_v6 = vld [vmem:[#allocation4 + $0x8] sm:$0xff]  ;;  %v2719_v7 = vld [vmem:[#allocation4] sm:$0xff]  ;;  %s2323_s11 = scalar_lea.hbm %s4036_s3, %s2791_s8  ;;  %s2312_s16 = scalar_lea.sflag [#allocation6], %s137_s4 }
  0x2a   : > { %v2742_v8 = vld [vmem:[#allocation4 + $0xb8] sm:$0xff]  ;;  %v2741_v16 = vld [vmem:[#allocation4 + $0xb0] sm:$0xff]  ;;  %v2740_v20 = vld [vmem:[#allocation4 + $0xa8] sm:$0xff]  ;;  %s2326_s19 = sshll.u32 %s2323_s11, 4  ;;  %s3249_s27 = scalar_lea.hbm %s4036_s3, 1408  ;;  %s2327_s19 = int_to_ptr.hbm [resolvable:$true] %s2326_s19 }
  0x2b   : > { %v2750_v9 = vld [vmem:[#allocation4 + $0xf8] sm:$0xff]  ;;  %v2749_v17 = vld [vmem:[#allocation4 + $0xf0] sm:$0xff]  ;;  %v2748_v21 = vld [vmem:[#allocation4 + $0xe8] sm:$0xff]  ;;  %s3243_s20 = sshra.s32 %s2327_s19, 4  ;;  %s3244_s20 = int_to_ptr.hbm [resolvable:$true] %s3243_s20 }
  0x2c   : > { %3076 = vmatpush.bf16.msra.mxu1 %v2725_v1  ;;  %3077 = vmatpush.bf16.msra.mxu2 %v2725_v1  ;;  %v3398_v10 = vld [vmem:[#allocation2 + $0x20] sm:$0xff]   ;;  %v2732_v22 = vld [vmem:[#allocation4 + $0x68] sm:$0xff]  ;;  %v2739_v24 = vld [vmem:[#allocation4 + $0xa0] sm:$0xff]  ;;  %s3245_s24 = scalar_lea.hbm %s3244_s20, 128  ;;  %p3250_p9 = scmp.lt.s32.totalorder %s3244_s20, %s4036_s3 }
  0x2d   : > { %3078 = vmatpush.bf16.msra.mxu3 %v2725_v1  ;;  %1415 = vmatpush.bf16.msra.mxu0 %v2725_v1  ;;  %v3400_v11 = vld [vmem:[#allocation2 + $0x40] sm:$0xff]   ;;  %v2756_v23 = vld [vmem:[#allocation4 + $0x128] sm:$0xff]  ;;  %v2747_v25 = vld [vmem:[#allocation4 + $0xe0] sm:$0xff]  ;;  %p3246_p4 = scmp.ne.s32.totalorder %s3244_s20, %s3245_s24  ;;  %p3251_p10 = scmp.lt.s32.totalorder %s3249_s27, %s3245_s24 }
  0x2e   : > { %v3402_v12 = vld [vmem:[#allocation2] sm:$0xff]  ;;  %v2731_v26 = vld [vmem:[#allocation4 + $0x60] sm:$0xff]  ;;  %v2736_v40 = vld [vmem:[#allocation4 + $0x88] sm:$0xff] }
  0x2f   : > { %v3404_v13 = vld [vmem:[#allocation2 + $0x60] sm:$0xff]   ;;  %v2755_v27 = vld [vmem:[#allocation4 + $0x120] sm:$0xff]  ;;  %v2744_v41 = vld [vmem:[#allocation4 + $0xc8] sm:$0xff]  ;;  %v309_v61 = vshll.u32 %v3402_v12, 16  ;;  %v307_v0 = vshrl.u32 %v3402_v12, 16  ;;  %p3247_p7 = pnand %p3246_p4, %p3363_p5  ;;  %p3252_p11 = por %p3251_p10, %p3250_p9 }
  0x30   : > { %3079 = vmatpush.bf16.msra.mxu1 %v2724_v2  ;;  %3080 = vmatpush.bf16.msra.mxu2 %v2724_v2  ;;  %v2734_v14 = vld [vmem:[#allocation4 + $0x78] sm:$0xff]  ;;  %v2733_v18 = vld [vmem:[#allocation4 + $0x70] sm:$0xff]  ;;  %v2728_v42 = vld [vmem:[#allocation4 + $0x48] sm:$0xff] }
  0x31   : > { %3081 = vmatpush.bf16.msra.mxu3 %v2724_v2  ;;  %1416 = vmatpush.bf16.msra.mxu0 %v2724_v2  ;;  %v2758_v15 = vld [vmem:[#allocation4 + $0x138] sm:$0xff]  ;;  %v2757_v19 = vld [vmem:[#allocation4 + $0x130] sm:$0xff]  ;;  %v2752_v43 = vld [vmem:[#allocation4 + $0x108] sm:$0xff]  ;;  %v311_v1 = vrot.slane %v309_v61, 1  ;;  %p3248_p8 = pneg %p3247_p7 }
  0x32   : > { %v2738_v28 = vld [vmem:[#allocation4 + $0x98] sm:$0xff]  ;;  %v2737_v36 = vld [vmem:[#allocation4 + $0x90] sm:$0xff]  ;;  %v2735_v44 = vld [vmem:[#allocation4 + $0x80] sm:$0xff] }
  0x33   : > { %v2746_v29 = vld [vmem:[#allocation4 + $0xd8] sm:$0xff]  ;;  %v2745_v37 = vld [vmem:[#allocation4 + $0xd0] sm:$0xff]  ;;  %v2743_v45 = vld [vmem:[#allocation4 + $0xc0] sm:$0xff]  ;;  %p3253_p12 = pnand %p3252_p11, %p3248_p8 }
  0x34   : > { %3082 = vmatpush.bf16.msra.mxu1 %v2723_v3  ;;  %3083 = vmatpush.bf16.msra.mxu2 %v2723_v3  ;;  %v3410_v30 = vld [vmem:[#allocation2 + $0x28] sm:$0xff]   ;;  %v2729_v38 = vld [vmem:[#allocation4 + $0x50] sm:$0xff]  ;;  %v3422_v48 = vld [vmem:[#allocation2 + $0x30] sm:$0xff]  }
  0x35   : > { %3084 = vmatpush.bf16.msra.mxu3 %v2723_v3  ;;  %1417 = vmatpush.bf16.msra.mxu0 %v2723_v3  ;;  %v3412_v31 = vld [vmem:[#allocation2 + $0x48] sm:$0xff]   ;;  %v2753_v39 = vld [vmem:[#allocation4 + $0x110] sm:$0xff]  ;;  %v3424_v49 = vld [vmem:[#allocation2 + $0x50] sm:$0xff]  }
  0x36   : > { %v3414_v32 = vld [vmem:[#allocation2 + $0x8] sm:$0xff]  ;;  %v3426_v50 = vld [vmem:[#allocation2 + $0x70] sm:$0xff]   ;;  %v3434_v56 = vld [vmem:[#allocation2 + $0x38] sm:$0xff]  }
  0x37   : > { %v3416_v33 = vld [vmem:[#allocation2 + $0x68] sm:$0xff]   ;;  %v3428_v51 = vld [vmem:[#allocation2 + $0x10] sm:$0xff]   ;;  %v3436_v57 = vld [vmem:[#allocation2 + $0x58] sm:$0xff]   ;;  %v314_v2 = vshll.u32 %v3414_v32, 16 }
  0x38   : > { %3085 = vmatpush.bf16.msra.mxu1 %v2722_v4  ;;  %3086 = vmatpush.bf16.msra.mxu2 %v2722_v4  ;;  %v2730_v34 = vld [vmem:[#allocation4 + $0x58] sm:$0xff]  ;;  %v2727_v46 = vld [vmem:[#allocation4 + $0x40] sm:$0xff]  ;;  %v3438_v58 = vld [vmem:[#allocation2 + $0x78] sm:$0xff]  }
  0x39   : > { %3087 = vmatpush.bf16.msra.mxu3 %v2722_v4  ;;  %1418 = vmatpush.bf16.msra.mxu0 %v2722_v4  ;;  %v2754_v35 = vld [vmem:[#allocation4 + $0x118] sm:$0xff]  ;;  %v2751_v47 = vld [vmem:[#allocation4 + $0x100] sm:$0xff]  ;;  %v3440_v59 = vld [vmem:[#allocation2 + $0x18] sm:$0xff]  }
  0x3a   : > { %v2774_v52 = vld [vmem:[#allocation4 + $0x1b8] sm:$0xff]  ;;  %v3039_v60 = vld [vmem:[#allocation2 + $0x14] sm:$0xff]   ;;  %v3041_v62 = vld [vmem:[#allocation2 + $0x1c] sm:$0xff]   ;;  %v334_v61 = vshrl.u32 %v3440_v59, 16 }
  0x3b   : > { %v2782_v53 = vld [vmem:[#allocation4 + $0x1f8] sm:$0xff]  ;;  %v550_v63 = vshll.u32 %v3039_v60, 16  ;;  %v548_v3 = vshrl.u32 %v3039_v60, 16 }
  0x3c   : > { %3088 = vmatpush.bf16.msra.mxu1 %v2721_v5  ;;  %3089 = vmatpush.bf16.msra.mxu2 %v2721_v5  ;;  %v2766_v54 = vld [vmem:[#allocation4 + $0x178] sm:$0xff] }
  0x3d   : > { %3090 = vmatpush.bf16.msra.mxu3 %v2721_v5  ;;  %1419 = vmatpush.bf16.msra.mxu0 %v2721_v5  ;;  %v2790_v55 = vld [vmem:[#allocation4 + $0x238] sm:$0xff]  ;;  %v552_v4 = vrot.slane %v550_v63, 1  ;;  %v555_v5 = vshll.u32 %v3041_v62, 16  ;;  %v2764_v63 = vld [vmem:[#allocation4 + $0x168] sm:$0xff] }
  0x40   : > { %3091 = vmatpush.bf16.msra.mxu1 %v2720_v6  ;;  %3092 = vmatpush.bf16.msra.mxu2 %v2720_v6 }
  0x41   : > { %3093 = vmatpush.bf16.msra.mxu3 %v2720_v6  ;;  %1420 = vmatpush.bf16.msra.mxu0 %v2720_v6  ;;  %v312_v6 = vor.u32 %v311_v1, %v307_v0 }
  0x44   : > { %3094 = vmatpush.bf16.msra.mxu1 %v2719_v7  ;;  %3095 = vmatpush.bf16.msra.mxu2 %v2719_v7 }
  0x45   : > { %3096 = vmatpush.bf16.msra.mxu3 %v2719_v7  ;;  %1421 = vmatpush.bf16.msra.mxu0 %v2719_v7  ;;  %v316_v7 = vrot.slane %v314_v2, 1  ;;  %v2788_v2 = vld [vmem:[#allocation4 + $0x228] sm:$0xff] }
  0x47   : > { %1442 = vmatmul.bf16.vlgmr.msra.gmra.mxu1 %v3398_v10  ;;  %1462 = vmatmul.bf16.vlgmr.msra.gmra.mxu2 %v3400_v11 }
  0x48   : > { %1592 = vmatpush.bf16.msrb.mxu2 %v2742_v8  ;;  %1482 = vmatmul.bf16.vlgmr.msra.gmra.mxu3 %v3404_v13  ;;  %v455_v8 = vrot.slane %v3402_v12, 1 }
  0x49   : > { %1681 = vmatpush.bf16.msrb.mxu3 %v2750_v9  ;;  %1422 = vmatmul.bf16.vlgmr.msra.gmra.mxu0 %v3402_v12  ;;  %v456_v9 = vrot.slane %v3414_v32, 1  ;;  %v3043_v12 = vld [vmem:[#allocation2 + $0x24] sm:$0xff]  }
  0x4a   : > { %1503 = vmatpush.bf16.msrb.mxu1 %v2734_v14  ;;  %1770 = vmatpush.bf16.msrb.mxu0 %v2758_v15  ;;  %v553_v14 = vor.u32 %v552_v4, %v548_v3  ;;  %v557_v15 = vrot.slane %v555_v5, 1  ;;  %v462_v5 = vrot.slane %v3398_v10, 1 }
  0x4c   : > { %1593 = vmatpush.bf16.msrb.mxu2 %v2741_v16  ;;  %v317_v16 = vsel %vm305_vm0, %v312_v6, %v316_v7 }
  0x4d   : > { %1682 = vmatpush.bf16.msrb.mxu3 %v2749_v17  ;;  %v457_v17 = vsel %vm454_vm1, %v455_v8, %v456_v9 }
  0x4e   : > { %1504 = vmatpush.bf16.msrb.mxu1 %v2733_v18  ;;  %1771 = vmatpush.bf16.msrb.mxu0 %v2757_v19  ;;  %v558_v18 = vsel %vm305_vm0, %v553_v14, %v557_v15  ;;  %v2773_v19 = vld [vmem:[#allocation4 + $0x1b0] sm:$0xff] }
  0x4f   : > { %v3049_v14 = vld [vmem:[#allocation2 + $0x3c] sm:$0xff]  }
  0x50   : > { %1594 = vmatpush.bf16.msrb.mxu2 %v2740_v20  ;;  %v2781_v20 = vld [vmem:[#allocation4 + $0x1f0] sm:$0xff] }
  0x51   : > { %1683 = vmatpush.bf16.msrb.mxu3 %v2748_v21  ;;  %v2765_v21 = vld [vmem:[#allocation4 + $0x170] sm:$0xff] }
  0x52   : > { %1505 = vmatpush.bf16.msrb.mxu1 %v2732_v22  ;;  %1772 = vmatpush.bf16.msrb.mxu0 %v2756_v23  ;;  %v2789_v22 = vld [vmem:[#allocation4 + $0x230] sm:$0xff]  ;;  %v318_v23 = vshrl.u32 %v3414_v32, 16 }
  0x54   : > { %1595 = vmatpush.bf16.msrb.mxu2 %v2739_v24  ;;  %v322_v24 = vshll.u32 %v3428_v51, 16 }
  0x55   : > { %1684 = vmatpush.bf16.msrb.mxu3 %v2747_v25  ;;  %v559_v25 = vshrl.u32 %v3041_v62, 16 }
  0x56   : > { %1506 = vmatpush.bf16.msrb.mxu1 %v2731_v26  ;;  %1773 = vmatpush.bf16.msrb.mxu0 %v2755_v27  ;;  %v563_v26 = vshll.u32 %v3043_v12, 16  ;;  %v320_v27 = vor.u32 %v318_v23, %v316_v7 }
  0x57   : > { %1447 = vmatmul.bf16.gmra.mxu1 %v3410_v30  ;;  %1467 = vmatmul.bf16.gmra.mxu2 %v3412_v31 }
  0x58   : > { %1596 = vmatpush.bf16.msrb.mxu2 %v2738_v28  ;;  %1487 = vmatmul.bf16.gmra.mxu3 %v3416_v33  ;;  %v324_v28 = vrot.slane %v322_v24, 1 }
  0x59   : > { %1685 = vmatpush.bf16.msrb.mxu3 %v2746_v29  ;;  %1427 = vmatmul.bf16.gmra.mxu0 %v3414_v32  ;;  %v458_v29 = vrot.slane %v3428_v51, 1  ;;  %v3045_v32 = vld [vmem:[#allocation2 + $0x2c] sm:$0xff]  }
  0x5a   : > { %1507 = vmatpush.bf16.msrb.mxu1 %v2730_v34  ;;  %1774 = vmatpush.bf16.msrb.mxu0 %v2754_v35  ;;  %v561_v34 = vor.u32 %v559_v25, %v557_v15  ;;  %v565_v35 = vrot.slane %v563_v26, 1  ;;  %v575_v0 = vshrl.u32 %v3045_v32, 16  ;;  %v342_v15 = vshrl.u32 %v3398_v10, 16 }
  0x5c   : > { %1597 = vmatpush.bf16.msrb.mxu2 %v2737_v36  ;;  %v325_v36 = vsel %vm305_vm0, %v320_v27, %v324_v28 }
  0x5d   : > { %1686 = vmatpush.bf16.msrb.mxu3 %v2745_v37  ;;  %v459_v37 = vsel %vm454_vm1, %v456_v9, %v458_v29 }
  0x5e   : > { %1508 = vmatpush.bf16.msrb.mxu1 %v2729_v38  ;;  %1775 = vmatpush.bf16.msrb.mxu0 %v2753_v39  ;;  %v566_v38 = vsel %vm305_vm0, %v561_v34, %v565_v35  ;;  %v326_v39 = vshrl.u32 %v3428_v51, 16  ;;  %v2779_v34 = vld [vmem:[#allocation4 + $0x1e0] sm:$0xff] }
  0x60   : > { %1598 = vmatpush.bf16.msrb.mxu2 %v2736_v40  ;;  %v330_v40 = vshll.u32 %v3440_v59, 16 }
  0x61   : > { %1687 = vmatpush.bf16.msrb.mxu3 %v2744_v41  ;;  %v567_v41 = vshrl.u32 %v3043_v12, 16 }
  0x62   : > { %1509 = vmatpush.bf16.msrb.mxu1 %v2728_v42  ;;  %1776 = vmatpush.bf16.msrb.mxu0 %v2752_v43  ;;  %v571_v42 = vshll.u32 %v3045_v32, 16  ;;  %v328_v43 = vor.u32 %v326_v39, %v324_v28 }
  0x64   : > { %1599 = vmatpush.bf16.msrb.mxu2 %v2735_v44  ;;  %v332_v44 = vrot.slane %v330_v40, 1  ;;  %v350_v40 = vshrl.u32 %v3410_v30, 16 }
  0x65   : > { %1688 = vmatpush.bf16.msrb.mxu3 %v2743_v45  ;;  %v460_v45 = vrot.slane %v3440_v59, 1 }
  0x66   : > { %1510 = vmatpush.bf16.msrb.mxu1 %v2727_v46  ;;  %1777 = vmatpush.bf16.msrb.mxu0 %v2751_v47  ;;  %v569_v46 = vor.u32 %v567_v41, %v565_v35  ;;  %v573_v47 = vrot.slane %v571_v42, 1  ;;  %v336_v3 = vor.u32 %v334_v61, %v332_v44  ;;  %v3488_v35 = vld [vmem:[#allocation2 + $0x44] sm:$0xff]   ;;  %v354_v41 = vshll.u32 %v3422_v48, 16  ;;  %v2763_v42 = vld [vmem:[#allocation4 + $0x160] sm:$0xff] }
  0x67   : > { %1452 = vmatmul.bf16.gmra.mxu1 %v3422_v48  ;;  %1472 = vmatmul.bf16.gmra.mxu2 %v3424_v49  ;;  %v463_v9 = vsel %vm454_vm1, %v460_v45, %v462_v5 }
  0x68   : > { %1492 = vmatmul.bf16.gmra.mxu3 %v3426_v50  ;;  %1948 = vmatpush.bf16.msra.mxu2 %v2774_v52  ;;  %v333_v52 = vsel %vm305_vm0, %v328_v43, %v332_v44  ;;  %v577_v6 = vor.u32 %v575_v0, %v573_v47 }
  0x69   : > { %1432 = vmatmul.bf16.gmra.mxu0 %v3428_v51  ;;  %2037 = vmatpush.bf16.msra.mxu3 %v2782_v53  ;;  %v461_v53 = vsel %vm454_vm1, %v458_v29, %v460_v45  ;;  %v2772_v51 = vld [vmem:[#allocation4 + $0x1a8] sm:$0xff]  ;;  %v2771_v29 = vld [vmem:[#allocation4 + $0x1a0] sm:$0xff]  ;;  %v591_v45 = vshrl.u32 %v3049_v14, 16 }
  0x6a   : > { %1859 = vmatpush.bf16.msra.mxu1 %v2766_v54  ;;  %2126 = vmatpush.bf16.msra.mxu0 %v2790_v55  ;;  %v574_v54 = vsel %vm305_vm0, %v569_v46, %v573_v47  ;;  %v2780_v55 = vld [vmem:[#allocation4 + $0x1e8] sm:$0xff]  ;;  %v595_v46 = vshll.u32 %v3488_v35, 16  ;;  %v2787_v47 = vld [vmem:[#allocation4 + $0x220] sm:$0xff] }
  0x6c   : > { %1949 = vmatpush.bf16.msra.mxu2 %v2773_v19 }
  0x6d   : > { %2038 = vmatpush.bf16.msra.mxu3 %v2781_v20 }
  0x6e   : > { %1860 = vmatpush.bf16.msra.mxu1 %v2765_v21  ;;  %2127 = vmatpush.bf16.msra.mxu0 %v2789_v22  ;;  %v464_v21 = vrot.slane %v3410_v30, 1 }
  0x70   : > { %1950 = vmatpush.bf16.msra.mxu2 %v2772_v51 }
  0x71   : > { %2039 = vmatpush.bf16.msra.mxu3 %v2780_v55 }
  0x72   : > { %1861 = vmatpush.bf16.msra.mxu1 %v2764_v63  ;;  %2128 = vmatpush.bf16.msra.mxu0 %v2788_v2 }
  0x74   : > { %1951 = vmatpush.bf16.msra.mxu2 %v2771_v29 }
  0x75   : > { %2040 = vmatpush.bf16.msra.mxu3 %v2779_v34 }
  0x76   : > { %1862 = vmatpush.bf16.msra.mxu1 %v2763_v42  ;;  %2129 = vmatpush.bf16.msra.mxu0 %v2787_v47  ;;  %v2778_v42 = vld [vmem:[#allocation4 + $0x1d8] sm:$0xff] }
  0x77   : > { %1457 = vmatmul.bf16.gmra.mxu1 %v3434_v56  ;;  %1477 = vmatmul.bf16.gmra.mxu2 %v3436_v57 }
  0x78   : > { %1497 = vmatmul.bf16.gmra.mxu3 %v3438_v58 }
  0x79   : > { %1437 = vmatmul.bf16.gmra.mxu0 %v3440_v59  ;;  %2041 = vmatpush.bf16.msra.mxu3 %v2778_v42 }
  0x87   : > { %1511 = vmatmul.bf16.vlgmr.msrb.gmra.mxu1 %v317_v16  ;;  %1600 = vmatmul.bf16.vlgmr.msrb.gmra.mxu2 %v457_v17  ;;  %v346_v16 = vshll.u32 %v3410_v30, 16  ;;  %v597_v30 = vrot.slane %v595_v46, 1 }
  0x88   : > { %1689 = vmatmul.bf16.vlgmr.msrb.gmra.mxu3 %v3039_v60  ;;  %v3047_v60 = vld [vmem:[#allocation2 + $0x34] sm:$0xff]  }
  0x89   : > { %1778 = vmatmul.bf16.vlgmr.msrb.gmra.mxu0 %v558_v18  ;;  %v579_v1 = vshll.u32 %v3047_v60, 16  ;;  %v583_v17 = vshrl.u32 %v3047_v60, 16  ;;  %v587_v18 = vshll.u32 %v3049_v14, 16  ;;  %v348_v20 = vrot.slane %v346_v16, 1 }
  0x8a   : > { %v362_v16 = vshll.u32 %v3434_v56, 16 }
  0x8b   : > { %v581_v7 = vrot.slane %v579_v1, 1  ;;  %v589_v23 = vrot.slane %v587_v18, 1  ;;  %v599_v18 = vshrl.u32 %v3488_v35, 16 }
  0x8d   : > { %v582_v59 = vsel %vm305_vm0, %v577_v6, %v581_v7  ;;  %v585_v22 = vor.u32 %v583_v17, %v581_v7  ;;  %v593_v51 = vor.u32 %v591_v45, %v589_v23  ;;  %v3564_v45 = vld [vmem:[#allocation2 + $0x54] sm:$0xff]  }
  0x8e   : > { %4049 = vst [vmem:[#allocation20_spill] sm:$0xff] %v3564_v45 }
  0x8f   : > { %v590_v28 = vsel %vm305_vm0, %v585_v22, %v589_v23  ;;  %v468_v22 = vrot.slane %v3434_v56, 1  ;;  %v601_v23 = vor.u32 %v599_v18, %v597_v30 }
  0x97   : > { %1516 = vmatmul.bf16.gmra.mxu1 %v325_v36  ;;  %1605 = vmatmul.bf16.gmra.mxu2 %v459_v37 }
  0x98   : > { %1694 = vmatmul.bf16.gmra.mxu3 %v3041_v62  ;;  %v338_v62 = vshll.u32 %v3398_v10, 16  ;;  %v465_v10 = vsel %vm454_vm1, %v462_v5, %v464_v21  ;;  %v3525_v5 = vld [vmem:[#allocation2 + $0x4c] sm:$0xff]  }
  0x99   : > { %1783 = vmatmul.bf16.gmra.mxu0 %v566_v38  ;;  %4046 = vst [vmem:[#allocation17_spill] sm:$0xff] %v3525_v5 }
  0x9a   : > { %v340_v4 = vrot.slane %v338_v62, 1 }
  0x9c   : > { %v341_v8 = vsel %vm305_vm0, %v336_v3, %v340_v4  ;;  %v344_v19 = vor.u32 %v342_v15, %v340_v4  ;;  %v598_v4 = vsel %vm305_vm0, %v593_v51, %v597_v30  ;;  %v358_v15 = vshrl.u32 %v3422_v48, 16 }
  0x9d   : > { %v366_v51 = vshrl.u32 %v3434_v56, 16 }
  0x9e   : > { %v349_v25 = vsel %vm305_vm0, %v344_v19, %v348_v20  ;;  %v603_v19 = vshll.u32 %v3525_v5, 16 }
  0xa7   : > { %1521 = vmatmul.bf16.gmra.mxu1 %v333_v52  ;;  %1610 = vmatmul.bf16.gmra.mxu2 %v461_v53  ;;  %v352_v52 = vor.u32 %v350_v40, %v348_v20  ;;  %v356_v53 = vrot.slane %v354_v41, 1  ;;  %v2770_v41 = vld [vmem:[#allocation4 + $0x198] sm:$0xff] }
  0xa8   : > { %1699 = vmatmul.bf16.gmra.mxu3 %v3043_v12  ;;  %v3478_v12 = vld [vmem:[%s4035_s2] ss:$0 sm:$0xff]  ;;  %1952 = vmatpush.bf16.msra.mxu2 %v2770_v41 }
  0xa9   : > { %1788 = vmatmul.bf16.gmra.mxu0 %v574_v54  ;;  %v466_v54 = vrot.slane %v3422_v48, 1  ;;  %v3512_v0 = vsel %vm305_vm0, %v352_v52, %v356_v53  ;;  %v360_v20 = vor.u32 %v358_v15, %v356_v53  ;;  %v470_v15 = vrot.slane %v3400_v11, 1  ;;  %v3603_v41 = vld [vmem:[#allocation2 + $0x5c] sm:$0xff]  }
  0xab   : > { %v3515_v1 = vsel %vm454_vm1, %v464_v21, %v466_v54  ;;  %v364_v21 = vrot.slane %v362_v16, 1 }
  0xad   : > { %v3550_v34 = vsel %vm305_vm0, %v360_v20, %v364_v21 }
  0xb7   : > { %1526 = vmatmul.bf16.gmra.mxu1 %v341_v8  ;;  %1615 = vmatmul.bf16.gmra.mxu2 %v463_v9 }
  0xb8   : > { %1704 = vmatmul.bf16.gmra.mxu3 %v3045_v32 }
  0xb9   : > { %1793 = vmatmul.bf16.gmra.mxu0 %v582_v59 }
  0xc4   : > { %v1443_v24 = vpop.f32.mrf.mxu1 }
  0xc5   : > { %v3483_v26 = vadd.f32 %v3478_v12, %v1443_v24  ;;  %v605_v24 = vrot.slane %v603_v19, 1 }
  0xc6   : > { %v3485_v27 = vpop.f32.mrf.mxu0 }
  0xc7   : > { %1531 = vmatmul.bf16.gmra.mxu1 %v349_v25  ;;  %1620 = vmatmul.bf16.gmra.mxu2 %v465_v10  ;;  %v606_v40 = vsel %vm305_vm0, %v601_v23, %v605_v24 }
  0xc8   : > { %1709 = vmatmul.bf16.gmra.mxu3 %v3047_v60 }
  0xc9   : > { %1798 = vmatmul.bf16.gmra.mxu0 %v590_v28 }
  0xca   : > { %v1463_v36 = vpop.f32.mrf.mxu2 }
  0xcb   : > { %v3491_v37 = vadd.f32 %v3478_v12, %v1463_v36  ;;  %v1483_v38 = vpop.f32.mrf.mxu3  ;;  %v3553_v36 = vsel %vm454_vm1, %v466_v54, %v468_v22 }
  0xcc   : > { %v3494_v32 = vadd.f32 %v3478_v12, %v1483_v38  ;;  %v1445_v39 = vpop.f32.mrf.mxu1 }
  0xcd   : > { %v3499_v43 = vadd.f32 %v3478_v12, %v1445_v39 }
  0xce   : > { %4044 = vst [vmem:[#allocation15_spill] sm:$0xff] %v3494_v32  ;;  %v3501_v44 = vpop.f32.mrf.mxu0 }
  0xd2   : > { %v1465_v55 = vpop.f32.mrf.mxu2 }
  0xd3   : > { %v3506_v60 = vadd.f32 %v3478_v12, %v1465_v55  ;;  %v1485_v61 = vpop.f32.mrf.mxu3 }
  0xd4   : > { %v3509_v62 = vadd.f32 %v3478_v12, %v1485_v61  ;;  %v1448_v63 = vpop.f32.mrf.mxu1  ;;  %v607_v61 = vshrl.u32 %v3525_v5, 16 }
  0xd5   : > { %v3518_v2 = vadd.f32 %v3478_v12, %v1448_v63  ;;  %v611_v63 = vshll.u32 %v3564_v45, 16 }
  0xd6   : > { %4045 = vst [vmem:[#allocation16_spill] sm:$0xff] %v3509_v62  ;;  %v3520_v3 = vpop.f32.mrf.mxu0  ;;  %v609_v56 = vor.u32 %v607_v61, %v605_v24 }
  0xd7   : > { %1536 = vmatmul.bf16.gmra.mxu1 %v3512_v0  ;;  %1625 = vmatmul.bf16.gmra.mxu2 %v3515_v1  ;;  %v613_v16 = vrot.slane %v611_v63, 1 }
  0xd8   : > { %1714 = vmatmul.bf16.gmra.mxu3 %v3049_v14 }
  0xd9   : > { %1803 = vmatmul.bf16.gmra.mxu0 %v598_v4  ;;  %v2762_v4 = vld [vmem:[#allocation4 + $0x158] sm:$0xff] }
  0xda   : > { %v1468_v6 = vpop.f32.mrf.mxu2  ;;  %1863 = vmatpush.bf16.msra.mxu1 %v2762_v4  ;;  %v615_v4 = vshrl.u32 %v3564_v45, 16 }
  0xdb   : > { %v3528_v7 = vadd.f32 %v3478_v12, %v1468_v6  ;;  %v1488_v8 = vpop.f32.mrf.mxu3  ;;  %v2786_v6 = vld [vmem:[#allocation4 + $0x218] sm:$0xff] }
  0xdc   : > { %v3531_v9 = vadd.f32 %v3478_v12, %v1488_v8  ;;  %v1450_v59 = vpop.f32.mrf.mxu1  ;;  %2130 = vmatpush.bf16.msra.mxu0 %v2786_v6  ;;  %v368_v8 = vor.u32 %v366_v51, %v364_v21  ;;  %v374_v51 = vshrl.u32 %v3400_v11, 16  ;;  %v619_v6 = vshll.u32 %v3603_v41, 16 }
  0xdd   : > { %v3536_v17 = vadd.f32 %v3478_v12, %v1450_v59 }
  0xde   : > { %4047 = vst [vmem:[#allocation18_spill] sm:$0xff] %v3531_v9  ;;  %v3538_v14 = vpop.f32.mrf.mxu0 }
  0xe2   : > { %v1470_v25 = vpop.f32.mrf.mxu2 }
  0xe3   : > { %v3544_v48 = vadd.f32 %v3478_v12, %v1470_v25  ;;  %v1490_v10 = vpop.f32.mrf.mxu3 }
  0xe4   : > { %v3547_v28 = vadd.f32 %v3478_v12, %v1490_v10  ;;  %v1453_v29 = vpop.f32.mrf.mxu1 }
  0xe5   : > { %v3556_v38 = vadd.f32 %v3478_v12, %v1453_v29  ;;  %v3592_v29 = vsel %vm454_vm1, %v468_v22, %v470_v15 }
  0xe6   : > { %4048 = vst [vmem:[#allocation19_spill] sm:$0xff] %v3547_v28  ;;  %v3558_v39 = vpop.f32.mrf.mxu0  ;;  %v2761_v28 = vld [vmem:[#allocation4 + $0x150] sm:$0xff] }
  0xe7   : > { %1541 = vmatmul.bf16.gmra.mxu1 %v3550_v34  ;;  %1630 = vmatmul.bf16.gmra.mxu2 %v3553_v36 }
  0xe8   : > { %1719 = vmatmul.bf16.gmra.mxu3 %v3488_v35  ;;  %v370_v35 = vshll.u32 %v3400_v11, 16  ;;  %v1424_v11 = vadd.f32 %v3478_v12, %v3485_v27  ;;  %v2769_v27 = vld [vmem:[#allocation4 + $0x190] sm:$0xff]  ;;  %1864 = vmatpush.bf16.msra.mxu1 %v2761_v28 }
  0xe9   : > { %1808 = vmatmul.bf16.gmra.mxu0 %v606_v40  ;;  %v614_v40 = vsel %vm305_vm0, %v609_v56, %v613_v16  ;;  %1953 = vmatpush.bf16.msra.mxu2 %v2769_v27  ;;  %v2785_v27 = vld [vmem:[#allocation4 + $0x210] sm:$0xff] }
  0xea   : > { %v1473_v46 = vpop.f32.mrf.mxu2  ;;  %v372_v59 = vrot.slane %v370_v35, 1  ;;  %v378_v35 = vshll.u32 %v3412_v31, 16  ;;  %2131 = vmatpush.bf16.msra.mxu0 %v2785_v27  ;;  %v394_v27 = vshll.u32 %v3436_v57, 16 }
  0xeb   : > { %v3567_v47 = vadd.f32 %v3478_v12, %v1473_v46  ;;  %v1493_v52 = vpop.f32.mrf.mxu3 }
  0xec   : > { %v3570_v53 = vadd.f32 %v3478_v12, %v1493_v52  ;;  %v1455_v54 = vpop.f32.mrf.mxu1  ;;  %v3589_v10 = vsel %vm305_vm0, %v368_v8, %v372_v59  ;;  %v376_v8 = vor.u32 %v374_v51, %v372_v59  ;;  %v380_v56 = vrot.slane %v378_v35, 1 }
  0xed   : > { %v3575_v30 = vadd.f32 %v3478_v12, %v1455_v54 }
  0xee   : > { %4050 = vst [vmem:[#allocation21_spill] sm:$0xff] %v3570_v53  ;;  %v3577_v55 = vpop.f32.mrf.mxu0  ;;  %v623_v53 = vshrl.u32 %v3603_v41, 16 }
  0xf2   : > { %v1475_v18 = vpop.f32.mrf.mxu2 }
  0xf3   : > { %v3583_v19 = vadd.f32 %v3478_v12, %v1475_v18  ;;  %v1495_v20 = vpop.f32.mrf.mxu3  ;;  %v472_v18 = vrot.slane %v3412_v31, 1 }
  0xf4   : > { %v3586_v23 = vadd.f32 %v3478_v12, %v1495_v20  ;;  %v1458_v25 = vpop.f32.mrf.mxu1  ;;  %v617_v20 = vor.u32 %v615_v4, %v613_v16  ;;  %v2777_v4 = vld [vmem:[#allocation4 + $0x1d0] sm:$0xff] }
  0xf5   : > { %v3595_v21 = vadd.f32 %v3478_v12, %v1458_v25  ;;  %v621_v25 = vrot.slane %v619_v6, 1  ;;  %v3633_v59 = vsel %vm454_vm1, %v470_v15, %v472_v18  ;;  %v3639_v6 = vld [vmem:[#allocation2 + $0x64] sm:$0xff]   ;;  %2042 = vmatpush.bf16.msra.mxu3 %v2777_v4  ;;  %v1426_v15 = vadd.f32 %v3478_v12, %v3501_v44 }
  0xf6   : > { %4051 = vst [vmem:[#allocation22_spill] sm:$0xff] %v3586_v23  ;;  %v3597_v24 = vpop.f32.mrf.mxu0  ;;  %v3630_v23 = vsel %vm305_vm0, %v376_v8, %v380_v56 }
  0xf7   : > { %1546 = vmatmul.bf16.gmra.mxu1 %v3589_v10  ;;  %1635 = vmatmul.bf16.gmra.mxu2 %v3592_v29  ;;  %v622_v35 = vsel %vm305_vm0, %v617_v20, %v621_v25  ;;  %4054 = vst [vmem:[#allocation25_spill] sm:$0xff] %v3639_v6 }
  0xf8   : > { %1724 = vmatmul.bf16.gmra.mxu3 %v3525_v5  ;;  %v627_v5 = vshll.u32 %v3639_v6, 16 }
  0xf9   : > { %1813 = vmatmul.bf16.gmra.mxu0 %v614_v40 }
  0xfa   : > { %v1478_v42 = vpop.f32.mrf.mxu2  ;;  %v629_v9 = vrot.slane %v627_v5, 1 }
  0xfb   : > { %v3606_v22 = vadd.f32 %v3478_v12, %v1478_v42  ;;  %v1498_v46 = vpop.f32.mrf.mxu3 }
  0xfc   : > { %v3609_v52 = vadd.f32 %v3478_v12, %v1498_v46  ;;  %v1460_v54 = vpop.f32.mrf.mxu1 }
  0xfd   : > { %v3614_v61 = vadd.f32 %v3478_v12, %v1460_v54 }
  0xfe   : > { %4052 = vst [vmem:[#allocation23_spill] sm:$0xff] %v3609_v52  ;;  %v3616_v63 = vpop.f32.mrf.mxu0 }
 0x102   : > { %v1480_v40 = vpop.f32.mrf.mxu2 }
 0x103   : > { %v3624_v42 = vadd.f32 %v3478_v12, %v1480_v40  ;;  %v1500_v46 = vpop.f32.mrf.mxu3 }
 0x104   : > { %v3627_v54 = vadd.f32 %v3478_v12, %v1500_v46  ;;  %v1512_v52 = vpop.f32.mrf.mxu1  ;;  %v386_v46 = vshll.u32 %v3424_v49, 16 }
 0x105   : > { %v1513_v16 = vadd.f32 %v1512_v52, %v1424_v11  ;;  %v382_v11 = vshrl.u32 %v3412_v31, 16  ;;  %v625_v31 = vor.u32 %v623_v53, %v621_v25 }
 0x106   : > { %4053 = vst [vmem:[#allocation24_spill] sm:$0xff] %v3627_v54  ;;  %v1779_v51 = vpop.f32.mrf.mxu0 }
 0x107   : > { %1551 = vmatmul.bf16.gmra.mxu1 %v3630_v23  ;;  %1640 = vmatmul.bf16.gmra.mxu2 %v3633_v59  ;;  %v384_v44 = vor.u32 %v382_v11, %v380_v56  ;;  %v630_v11 = vsel %vm305_vm0, %v625_v31, %v629_v9 }
 0x108   : > { %1729 = vmatmul.bf16.gmra.mxu3 %v3564_v45 }
 0x109   : > { %1818 = vmatmul.bf16.gmra.mxu0 %v622_v35 }
 0x10a   : > { %v1601_v8 = vpop.f32.mrf.mxu2 }
 0x10b   : > { %v1602_v52 = vadd.f32 %v1601_v8, %v1513_v16  ;;  %v1690_v40 = vpop.f32.mrf.mxu3  ;;  %v388_v16 = vrot.slane %v386_v46, 1  ;;  %v474_v8 = vrot.slane %v3424_v49, 1  ;;  %v390_v46 = vshrl.u32 %v3424_v49, 16 }
 0x10c   : > { %v1514_v20 = vpop.f32.mrf.mxu1  ;;  %v1434_v49 = vadd.f32 %v3478_v12, %v3558_v39  ;;  %v3689_v39 = vld [vmem:[#allocation2 + $0x74] sm:$0xff]  }
 0x10d   : > { %v1691_v54 = vadd.f32 %v1690_v40, %v1602_v52  ;;  %v1515_v45 = vadd.f32 %v1514_v20, %v1426_v15  ;;  %v1429_v15 = vadd.f32 %v3478_v12, %v3520_v3  ;;  %v3653_v32 = vsel %vm305_vm0, %v384_v44, %v388_v16 }
 0x10e   : > { %v1781_v35 = vpop.f32.mrf.mxu0  ;;  %v3656_v28 = vsel %vm454_vm1, %v472_v18, %v474_v8 }
 0x10f   : > { %v3647_v4 = vadd.f32 %v1779_v51, %v1691_v54 }
 0x112   : > { %v1603_v62 = vpop.f32.mrf.mxu2 }
 0x113   : > { %v1604_v52 = vadd.f32 %v1603_v62, %v1515_v45  ;;  %v1692_v40 = vpop.f32.mrf.mxu3  ;;  %v3664_v62 = vld [vmem:[#allocation2 + $0x6c] sm:$0xff]   ;;  %v1431_v45 = vadd.f32 %v3478_v12, %v3538_v14  ;;  %v476_v14 = vrot.slane %v3436_v57, 1 }
 0x114   : > { %v1517_v20 = vpop.f32.mrf.mxu1  ;;  %4056 = vst [vmem:[#allocation27_spill] sm:$0xff] %v3664_v62 }
 0x115   : > { %v1693_v54 = vadd.f32 %v1692_v40, %v1604_v52  ;;  %v1518_v56 = vadd.f32 %v1517_v20, %v1429_v15  ;;  %v631_v15 = vshrl.u32 %v3639_v6, 16  ;;  %v635_v52 = vshll.u32 %v3664_v62, 16 }
 0x116   : > { %v1784_v51 = vpop.f32.mrf.mxu0  ;;  %v392_v20 = vor.u32 %v390_v46, %v388_v16 }
 0x117   : > { %1556 = vmatmul.bf16.gmra.mxu1 %v3653_v32  ;;  %1645 = vmatmul.bf16.gmra.mxu2 %v3656_v28  ;;  %v3661_v5 = vadd.f32 %v1781_v35, %v1693_v54  ;;  %v396_v54 = vrot.slane %v394_v27, 1 }
 0x118   : > { %1734 = vmatmul.bf16.gmra.mxu3 %v3603_v41 }
 0x119   : > { %4055 = vst [vmem:[#allocation26_spill] sm:$0xff] %v3661_v5  ;;  %1823 = vmatmul.bf16.gmra.mxu0 %v630_v11  ;;  %v637_v11 = vrot.slane %v635_v52, 1 }
 0x11a   : > { %v1606_v3 = vpop.f32.mrf.mxu2 }
 0x11b   : > { %v1607_v53 = vadd.f32 %v1606_v3, %v1518_v56  ;;  %v1695_v18 = vpop.f32.mrf.mxu3  ;;  %v633_v56 = vor.u32 %v631_v15, %v629_v9 }
 0x11c   : > { %v1519_v25 = vpop.f32.mrf.mxu1 }
 0x11d   : > { %v1696_v44 = vadd.f32 %v1695_v18, %v1607_v53  ;;  %v1520_v31 = vadd.f32 %v1519_v25, %v1431_v45  ;;  %v3678_v18 = vsel %vm305_vm0, %v392_v20, %v396_v54  ;;  %v3681_v25 = vsel %vm454_vm1, %v474_v8, %v476_v14 }
 0x11e   : > { %v1786_v35 = vpop.f32.mrf.mxu0  ;;  %v638_v27 = vsel %vm305_vm0, %v633_v56, %v637_v11  ;;  %v398_v20 = vshrl.u32 %v3436_v57, 16  ;;  %v478_v57 = vrot.slane %v3404_v13, 1 }
 0x11f   : > { %v3672_v40 = vadd.f32 %v1784_v51, %v1696_v44  ;;  %v2768_v44 = vld [vmem:[#allocation4 + $0x188] sm:$0xff] }
 0x120   : > { %1954 = vmatpush.bf16.msra.mxu2 %v2768_v44  ;;  %v2784_v44 = vld [vmem:[#allocation4 + $0x208] sm:$0xff] }
 0x121   : > { %4057 = vst [vmem:[#allocation28_spill] sm:$0xff] %v3672_v40  ;;  %2132 = vmatpush.bf16.msra.mxu0 %v2784_v44 }
 0x122   : > { %v1608_v3 = vpop.f32.mrf.mxu2 }
 0x123   : > { %v1609_v5 = vadd.f32 %v1608_v3, %v1520_v31  ;;  %v1697_v53 = vpop.f32.mrf.mxu3  ;;  %v2776_v31 = vld [vmem:[#allocation4 + $0x1c8] sm:$0xff]  ;;  %v639_v3 = vshrl.u32 %v3664_v62, 16 }
 0x124   : > { %v1522_v45 = vpop.f32.mrf.mxu1  ;;  %2043 = vmatpush.bf16.msra.mxu3 %v2776_v31  ;;  %v400_v31 = vor.u32 %v398_v20, %v396_v54 }
 0x125   : > { %v1698_v51 = vadd.f32 %v1697_v53, %v1609_v5  ;;  %v1523_v16 = vadd.f32 %v1522_v45, %v1434_v49  ;;  %v1436_v5 = vadd.f32 %v3478_v12, %v3577_v55  ;;  %v643_v49 = vshll.u32 %v3689_v39, 16 }
 0x126   : > { %v1789_v46 = vpop.f32.mrf.mxu0 }
 0x127   : > { %1561 = vmatmul.bf16.gmra.mxu1 %v3678_v18  ;;  %1650 = vmatmul.bf16.gmra.mxu2 %v3681_v25  ;;  %v3686_v9 = vadd.f32 %v1786_v35, %v1698_v51  ;;  %v402_v35 = vshll.u32 %v3404_v13, 16 }
 0x128   : > { %1739 = vmatmul.bf16.gmra.mxu3 %v3639_v6  ;;  %v3700_v6 = vld [vmem:[#allocation2 + $0x80] sm:$0xff]  }
 0x129   : > { %4058 = vst [vmem:[#allocation29_spill] sm:$0xff] %v3686_v9  ;;  %1828 = vmatmul.bf16.gmra.mxu0 %v638_v27  ;;  %v2760_v27 = vld [vmem:[#allocation4 + $0x148] sm:$0xff]  ;;  %v645_v9 = vrot.slane %v643_v49, 1  ;;  %v2847_v49 = vunpack.c.h.b16 %v3438_v58 }
 0x12a   : > { %v1611_v8 = vpop.f32.mrf.mxu2  ;;  %1865 = vmatpush.bf16.msra.mxu1 %v2760_v27 }
 0x12b   : > { %v1612_v15 = vadd.f32 %v1611_v8, %v1523_v16  ;;  %v1700_v52 = vpop.f32.mrf.mxu3  ;;  %v404_v16 = vrot.slane %v402_v35, 1  ;;  %v641_v8 = vor.u32 %v639_v3, %v637_v11 }
 0x12c   : > { %v1524_v56 = vpop.f32.mrf.mxu1 }
 0x12d   : > { %v1701_v53 = vadd.f32 %v1700_v52, %v1612_v15  ;;  %v1525_v45 = vadd.f32 %v1524_v56, %v1436_v5  ;;  %v1439_v15 = vadd.f32 %v3478_v12, %v3597_v24  ;;  %v3705_v54 = vsel %vm305_vm0, %v400_v31, %v404_v16 }
 0x12e   : > { %v1791_v51 = vpop.f32.mrf.mxu0  ;;  %v646_v20 = vsel %vm305_vm0, %v641_v8, %v645_v9  ;;  %v406_v8 = vshrl.u32 %v3404_v13, 16 }
 0x12f   : > { %v3697_v55 = vadd.f32 %v1789_v46, %v1701_v53  ;;  %v3708_v46 = vsel %vm454_vm1, %v476_v14, %v478_v57  ;;  %v3713_v53 = vunpack.c.l.b16 %v3700_v6 }
 0x131   : > { %4059 = vst [vmem:[#allocation30_spill] sm:$0xff] %v3697_v55 }
 0x132   : > { %v1613_v40 = vpop.f32.mrf.mxu2 }
 0x133   : > { %v1614_v5 = vadd.f32 %v1613_v40, %v1525_v45  ;;  %v1702_v52 = vpop.f32.mrf.mxu3  ;;  %v3721_v40 = vpack.c.b16 %v3713_v53, %v2847_v49  ;;  %v1441_v45 = vadd.f32 %v3478_v12, %v3616_v63  ;;  %v408_v49 = vor.u32 %v406_v8, %v404_v16  ;;  %v2767_v8 = vld [vmem:[#allocation4 + $0x180] sm:$0xff] }
 0x134   : > { %v1527_v56 = vpop.f32.mrf.mxu1  ;;  %v480_v12 = vrot.slane %v3416_v33, 1  ;;  %1955 = vmatpush.bf16.msra.mxu2 %v2767_v8 }
 0x135   : > { %v1703_v35 = vadd.f32 %v1702_v52, %v1614_v5  ;;  %v1528_v11 = vadd.f32 %v1527_v56, %v1439_v15  ;;  %v410_v15 = vshll.u32 %v3416_v33, 16  ;;  %v647_v56 = vshrl.u32 %v3689_v39, 16 }
 0x136   : > { %v1794_v3 = vpop.f32.mrf.mxu0 }
 0x137   : > { %1566 = vmatmul.bf16.gmra.mxu1 %v3705_v54  ;;  %1655 = vmatmul.bf16.gmra.mxu2 %v3708_v46  ;;  %v3717_v24 = vadd.f32 %v1791_v51, %v1703_v35  ;;  %v649_v63 = vor.u32 %v647_v56, %v645_v9  ;;  %v418_v56 = vshll.u32 %v3426_v50, 16 }
 0x138   : > { %1744 = vmatmul.bf16.gmra.mxu3 %v3664_v62 }
 0x139   : > { %4060 = vst [vmem:[#allocation31_spill] sm:$0xff] %v3717_v24  ;;  %1833 = vmatmul.bf16.gmra.mxu0 %v646_v20  ;;  %v651_v20 = vshll.u32 %v3721_v40, 16  ;;  %v412_v24 = vrot.slane %v410_v15, 1  ;;  %v2775_v15 = vld [vmem:[#allocation4 + $0x1c0] sm:$0xff]  ;;  %v420_v8 = vrot.slane %v418_v56, 1 }
 0x13a   : > { %v1616_v14 = vpop.f32.mrf.mxu2  ;;  %2044 = vmatpush.bf16.msra.mxu3 %v2775_v15 }
 0x13b   : > { %v1617_v27 = vadd.f32 %v1616_v14, %v1528_v11  ;;  %v1705_v44 = vpop.f32.mrf.mxu3  ;;  %v653_v11 = vrot.slane %v651_v20, 1 }
 0x13c   : > { %v1529_v31 = vpop.f32.mrf.mxu1 }
 0x13d   : > { %v1706_v5 = vadd.f32 %v1705_v44, %v1617_v27  ;;  %v1530_v51 = vadd.f32 %v1529_v31, %v1441_v45  ;;  %v3733_v27 = vsel %vm305_vm0, %v408_v49, %v412_v24  ;;  %v3736_v45 = vsel %vm454_vm1, %v478_v57, %v480_v12 }
 0x13e   : > { %v1796_v52 = vpop.f32.mrf.mxu0  ;;  %v654_v16 = vsel %vm305_vm0, %v649_v63, %v653_v11  ;;  %v655_v63 = vshrl.u32 %v3721_v40, 16 }
 0x13f   : > { %v3729_v35 = vadd.f32 %v1794_v3, %v1706_v5  ;;  %v3745_v5 = vld [vmem:[#allocation2 + $0x84] sm:$0xff]  }
 0x140   : > { %4063 = vst [vmem:[#allocation34_spill] sm:$0xff] %v3745_v5  ;;  %v657_v15 = vor.u32 %v655_v63, %v653_v11 }
 0x141   : > { %4061 = vst [vmem:[#allocation32_spill] sm:$0xff] %v3729_v35 }
 0x142   : > { %v1618_v14 = vpop.f32.mrf.mxu2 }
 0x143   : > { %v1619_v55 = vadd.f32 %v1618_v14, %v1530_v51  ;;  %v1707_v13 = vpop.f32.mrf.mxu3  ;;  %v414_v51 = vshrl.u32 %v3416_v33, 16  ;;  %v659_v14 = vshll.u32 %v3745_v5, 16  ;;  %v482_v33 = vrot.slane %v3426_v50, 1 }
 0x144   : > { %v1532_v62 = vpop.f32.mrf.mxu1 }
 0x145   : > { %v1708_v44 = vadd.f32 %v1707_v13, %v1619_v55  ;;  %v1533_v3 = vadd.f32 %v1532_v62, %v3483_v26  ;;  %v2759_v13 = vld [vmem:[#allocation4 + $0x140] sm:$0xff]  ;;  %v3759_v35 = vsel %vm454_vm1, %v480_v12, %v482_v33 }
 0x146   : > { %v1799_v31 = vpop.f32.mrf.mxu0  ;;  %1866 = vmatpush.bf16.msra.mxu1 %v2759_v13 }
 0x147   : > { %1571 = vmatmul.bf16.gmra.mxu1 %v3733_v27  ;;  %1660 = vmatmul.bf16.gmra.mxu2 %v3736_v45  ;;  %v3742_v9 = vadd.f32 %v1796_v52, %v1708_v44  ;;  %v2783_v44 = vld [vmem:[#allocation4 + $0x200] sm:$0xff] }
 0x148   : > { %1749 = vmatmul.bf16.gmra.mxu3 %v3689_v39  ;;  %2133 = vmatpush.bf16.msra.mxu0 %v2783_v44 }
 0x149   : > { %4062 = vst [vmem:[#allocation33_spill] sm:$0xff] %v3742_v9  ;;  %1838 = vmatmul.bf16.gmra.mxu0 %v654_v16 }
 0x14a   : > { %v1621_v57 = vpop.f32.mrf.mxu2 }
 0x14b   : > { %v1622_v26 = vadd.f32 %v1621_v57, %v1533_v3  ;;  %v1710_v62 = vpop.f32.mrf.mxu3  ;;  %v416_v3 = vor.u32 %v414_v51, %v412_v24  ;;  %v661_v57 = vrot.slane %v659_v14, 1  ;;  %v3768_v51 = vld [vmem:[#allocation2 + $0x8c] sm:$0xff]   ;;  %v426_v14 = vshll.u32 %v3438_v58, 16 }
 0x14c   : > { %v1534_v55 = vpop.f32.mrf.mxu1 }
 0x14d   : > { %v1711_v20 = vadd.f32 %v1710_v62, %v1622_v26  ;;  %v1535_v52 = vadd.f32 %v1534_v55, %v3499_v43  ;;  %v3756_v9 = vsel %vm305_vm0, %v416_v3, %v420_v8  ;;  %v662_v24 = vsel %vm305_vm0, %v657_v15, %v661_v57 }
 0x14e   : > { %v1801_v49 = vpop.f32.mrf.mxu0 }
 0x14f   : > { %v3752_v16 = vadd.f32 %v1799_v31, %v1711_v20 }
 0x151   : > { %4064 = vst [vmem:[#allocation35_spill] sm:$0xff] %v3752_v16 }
 0x152   : > { %v1623_v26 = vpop.f32.mrf.mxu2 }
 0x153   : > { %v1624_v62 = vadd.f32 %v1623_v26, %v1535_v52  ;;  %v1712_v43 = vpop.f32.mrf.mxu3  ;;  %v667_v26 = vshll.u32 %v3768_v51, 16 }
 0x154   : > { %v1537_v55 = vpop.f32.mrf.mxu1 }
 0x155   : > { %v1713_v13 = vadd.f32 %v1712_v43, %v1624_v62  ;;  %v1538_v31 = vadd.f32 %v1537_v55, %v3518_v2  ;;  %v422_v2 = vshrl.u32 %v3426_v50, 16  ;;  %v428_v55 = vrot.slane %v426_v14, 1 }
 0x156   : > { %v1804_v20 = vpop.f32.mrf.mxu0 }
 0x157   : > { %1576 = vmatmul.bf16.gmra.mxu1 %v3756_v9  ;;  %1665 = vmatmul.bf16.gmra.mxu2 %v3759_v35  ;;  %v3765_v11 = vadd.f32 %v1801_v49, %v1713_v13  ;;  %v663_v49 = vshrl.u32 %v3745_v5, 16  ;;  %v424_v43 = vor.u32 %v422_v2, %v420_v8  ;;  %v3778_v13 = vrot.slane %v3438_v58, 1 }
 0x158   : > { %1754 = vmatmul.bf16.gmra.mxu3 %v3721_v40 }
 0x159   : > { %4065 = vst [vmem:[#allocation36_spill] sm:$0xff] %v3765_v11  ;;  %1843 = vmatmul.bf16.gmra.mxu0 %v662_v24  ;;  %v669_v24 = vrot.slane %v667_v26, 1 }
 0x15a   : > { %v1626_v56 = vpop.f32.mrf.mxu2 }
 0x15b   : > { %v1627_v12 = vadd.f32 %v1626_v56, %v1538_v31  ;;  %v1715_v52 = vpop.f32.mrf.mxu3  ;;  %v665_v31 = vor.u32 %v663_v49, %v661_v57  ;;  %v3780_v56 = vld [vmem:[#allocation2 + $0x90] sm:$0xff]  }
 0x15c   : > { %v1539_v63 = vpop.f32.mrf.mxu1 }
 0x15d   : > { %v1716_v44 = vadd.f32 %v1715_v52, %v1627_v12  ;;  %v1540_v3 = vadd.f32 %v1539_v63, %v3536_v17  ;;  %v3783_v63 = vsel %vm305_vm0, %v424_v43, %v428_v55  ;;  %v670_v57 = vsel %vm305_vm0, %v665_v31, %v669_v24 }
 0x15e   : > { %v1806_v15 = vpop.f32.mrf.mxu0 }
 0x15f   : > { %v3775_v62 = vadd.f32 %v1804_v20, %v1716_v44  ;;  %v3787_v20 = vsel %vm454_vm1, %v482_v33, %v3778_v13  ;;  %v2859_v44 = vunpack.c.h.b16 %v3780_v56  ;;  %v304_v33 = vpack.c.b16 %v3713_v53, %v3713_v53 }
 0x161   : > { %4066 = vst [vmem:[#allocation37_spill] sm:$0xff] %v3775_v62  ;;  %v3799_v49 = vpack.c.b16 %v2859_v44, %v2859_v44  ;;  %v486_v62 = vrot.slane %v304_v33, 1 }
 0x162   : > { %v1628_v50 = vpop.f32.mrf.mxu2 }
 0x163   : > { %v1629_v12 = vadd.f32 %v1628_v50, %v1540_v3  ;;  %v1717_v52 = vpop.f32.mrf.mxu3  ;;  %v430_v50 = vshrl.u32 %v3438_v58, 16 }
 0x164   : > { %v1542_v17 = vpop.f32.mrf.mxu1 }
 0x165   : > { %v1718_v8 = vadd.f32 %v1717_v52, %v1629_v12  ;;  %v1543_v2 = vadd.f32 %v1542_v17, %v3556_v38  ;;  %v434_v12 = vshll.u32 %v304_v33, 16  ;;  %v3807_v53 = vor.u32 %v430_v50, %v428_v55 }
 0x166   : > { %v1809_v14 = vpop.f32.mrf.mxu0 }
 0x167   : > { %1581 = vmatmul.bf16.gmra.mxu1 %v3783_v63  ;;  %1670 = vmatmul.bf16.gmra.mxu2 %v3787_v20  ;;  %v3794_v3 = vadd.f32 %v1806_v15, %v1718_v8  ;;  %v671_v8 = vshrl.u32 %v3768_v51, 16  ;;  %v436_v44 = vrot.slane %v434_v12, 1 }
 0x168   : > { %1759 = vmatmul.bf16.gmra.mxu3 %v3745_v5 }
 0x169   : > { %4067 = vst [vmem:[#allocation38_spill] sm:$0xff] %v3794_v3  ;;  %1848 = vmatmul.bf16.gmra.mxu0 %v670_v57  ;;  %v675_v57 = vshll.u32 %v3799_v49, 16 }
 0x16a   : > { %v1631_v38 = vpop.f32.mrf.mxu2 }
 0x16b   : > { %v1632_v26 = vadd.f32 %v1631_v38, %v1543_v2  ;;  %v1720_v43 = vpop.f32.mrf.mxu3  ;;  %v673_v2 = vor.u32 %v671_v8, %v669_v24  ;;  %v677_v38 = vrot.slane %v675_v57, 1  ;;  %v3158_v8 = vld [vmem:[#allocation2 + $0x1c] sm:$0xff]  }
 0x16c   : > { %v1544_v31 = vpop.f32.mrf.mxu1  ;;  %v696_v57 = vrot.slane %v3158_v8, 1 }
 0x16d   : > { %v1721_v52 = vadd.f32 %v1720_v43, %v1632_v26  ;;  %v1545_v17 = vadd.f32 %v1544_v31, %v3575_v30  ;;  %v437_v30 = vsel %vm305_vm0, %v3807_v53, %v436_v44  ;;  %v487_v26 = vsel %vm454_vm1, %v3778_v13, %v486_v62 }
 0x16e   : > { %v1811_v15 = vpop.f32.mrf.mxu0  ;;  %v678_v55 = vsel %vm305_vm0, %v673_v2, %v677_v38 }
 0x16f   : > { %v3805_v3 = vadd.f32 %v1809_v14, %v1721_v52 }
 0x172   : > { %v1633_v11 = vpop.f32.mrf.mxu2 }
 0x173   : > { %v1634_v5 = vadd.f32 %v1633_v11, %v1545_v17  ;;  %v1722_v58 = vpop.f32.mrf.mxu3 }
 0x174   : > { %v1547_v16 = vpop.f32.mrf.mxu1 }
 0x175   : > { %v1723_v43 = vadd.f32 %v1722_v58, %v1634_v5  ;;  %v1548_v14 = vadd.f32 %v1547_v16, %v3595_v21  ;;  %v3157_v21 = vld [vmem:[#allocation2 + $0x14] sm:$0xff]  }
 0x176   : > { %v1814_v31 = vpop.f32.mrf.mxu0  ;;  %v695_v16 = vrot.slane %v3157_v21, 1 }
 0x177   : > { %1586 = vmatmul.bf16.gmra.mxu1 %v437_v30  ;;  %1675 = vmatmul.bf16.gmra.mxu2 %v487_v26  ;;  %v3815_v24 = vadd.f32 %v1811_v15, %v1723_v43 }
 0x178   : > { %1764 = vmatmul.bf16.gmra.mxu3 %v3768_v51  ;;  %v697_v58 = vsel %vm454_vm1, %v695_v16, %v696_v57 }
 0x179   : > { %1853 = vmatmul.bf16.gmra.mxu0 %v678_v55 }
 0x17a   : > { %v1636_v11 = vpop.f32.mrf.mxu2 }
 0x17b   : > { %v1637_v33 = vadd.f32 %v1636_v11, %v1548_v14  ;;  %v1725_v50 = vpop.f32.mrf.mxu3  ;;  %v3159_v14 = vld [vmem:[#allocation2 + $0x28] sm:$0xff]  }
 0x17c   : > { %v1549_v12 = vpop.f32.mrf.mxu1 }
 0x17d   : > { %v1726_v52 = vadd.f32 %v1725_v50, %v1637_v33  ;;  %v1550_v62 = vadd.f32 %v1549_v12, %v3614_v61 }
 0x17e   : > { %v1816_v5 = vpop.f32.mrf.mxu0 }
 0x17f   : > { %v3819_v17 = vadd.f32 %v1814_v31, %v1726_v52 }
 0x182   : > { %v1638_v44 = vpop.f32.mrf.mxu2 }
 0x183   : > { %v1639_v15 = vadd.f32 %v1638_v44, %v1550_v62  ;;  %v1727_v2 = vpop.f32.mrf.mxu3 }
 0x184   : > { %v1552_v38 = vpop.f32.mrf.mxu1 }
 0x185   : > { %v1728_v30 = vadd.f32 %v1727_v2, %v1639_v15  ;;  %v1553_v26 = vadd.f32 %v1552_v38, %v3491_v37  ;;  %v3160_v37 = vld [vmem:[#allocation2 + $0x24] sm:$0xff]   ;;  %v3161_v38 = vld [vmem:[#allocation2 + $0x30] sm:$0xff]  }
 0x186   : > { %v1819_v43 = vpop.f32.mrf.mxu0  ;;  %v698_v21 = vrot.slane %v3160_v37, 1 }
 0x187   : > { %1867 = vmatmul.bf16.vlgmr.msra.gmra.mxu1 %v697_v58  ;;  %1956 = vmatmul.bf16.vlgmr.msra.gmra.mxu2 %v3159_v14  ;;  %v3823_v61 = vadd.f32 %v1816_v5, %v1728_v30 }
 0x188   : > { %2045 = vmatmul.bf16.vlgmr.msra.gmra.mxu3 %v3512_v0  ;;  %v699_v0 = vsel %vm454_vm1, %v696_v57, %v698_v21 }
 0x189   : > { %2134 = vmatmul.bf16.vlgmr.msra.gmra.mxu0 %v3515_v1 }
 0x18a   : > { %v1641_v31 = vpop.f32.mrf.mxu2 }
 0x18b   : > { %v1642_v55 = vadd.f32 %v1641_v31, %v1553_v26  ;;  %v1730_v11 = vpop.f32.mrf.mxu3 }
 0x18c   : > { %v1554_v33 = vpop.f32.mrf.mxu1 }
 0x18d   : > { %v1731_v50 = vadd.f32 %v1730_v11, %v1642_v55  ;;  %v1555_v12 = vadd.f32 %v1554_v33, %v3506_v60 }
 0x18e   : > { %v1821_v52 = vpop.f32.mrf.mxu0 }
 0x18f   : > { %v3828_v62 = vadd.f32 %v1819_v43, %v1731_v50 }
 0x192   : > { %v1643_v16 = vpop.f32.mrf.mxu2 }
 0x193   : > { %v1644_v8 = vadd.f32 %v1643_v16, %v1555_v12  ;;  %v1732_v5 = vpop.f32.mrf.mxu3 }
 0x194   : > { %v1557_v44 = vpop.f32.mrf.mxu1 }
 0x195   : > { %v1733_v15 = vadd.f32 %v1732_v5, %v1644_v8  ;;  %v1558_v1 = vadd.f32 %v1557_v44, %v3528_v7  ;;  %v3162_v7 = vld [vmem:[#allocation2 + $0x2c] sm:$0xff]   ;;  %v3163_v8 = vld [vmem:[#allocation2 + $0x38] sm:$0xff]  }
 0x196   : > { %v1824_v2 = vpop.f32.mrf.mxu0  ;;  %v700_v11 = vrot.slane %v3162_v7, 1  ;;  %v3165_v7 = vld [vmem:[#allocation2 + $0x40] sm:$0xff]  }
 0x197   : > { %1872 = vmatmul.bf16.gmra.mxu1 %v699_v0  ;;  %1961 = vmatmul.bf16.gmra.mxu2 %v3161_v38  ;;  %v3832_v58 = vadd.f32 %v1821_v52, %v1733_v15 }
 0x198   : > { %2050 = vmatmul.bf16.gmra.mxu3 %v3550_v34  ;;  %v701_v34 = vsel %vm454_vm1, %v698_v21, %v700_v11 }
 0x199   : > { %2139 = vmatmul.bf16.gmra.mxu0 %v3553_v36 }
 0x19a   : > { %v1646_v60 = vpop.f32.mrf.mxu2 }
 0x19b   : > { %v1647_v30 = vadd.f32 %v1646_v60, %v1558_v1  ;;  %v1735_v26 = vpop.f32.mrf.mxu3 }
 0x19c   : > { %v1559_v43 = vpop.f32.mrf.mxu1 }
 0x19d   : > { %v1736_v14 = vadd.f32 %v1735_v26, %v1647_v30  ;;  %v1560_v57 = vadd.f32 %v1559_v43, %v3544_v48 }
 0x19e   : > { %v1826_v31 = vpop.f32.mrf.mxu0 }
 0x19f   : > { %v3837_v55 = vadd.f32 %v1824_v2, %v1736_v14 }
 0x1a2   : > { %v1648_v33 = vpop.f32.mrf.mxu2 }
 0x1a3   : > { %v1649_v50 = vadd.f32 %v1648_v33, %v1560_v57  ;;  %v1737_v12 = vpop.f32.mrf.mxu3 }
 0x1a4   : > { %v1562_v52 = vpop.f32.mrf.mxu1 }
 0x1a5   : > { %v1738_v37 = vadd.f32 %v1737_v12, %v1649_v50  ;;  %v1563_v36 = vadd.f32 %v1562_v52, %v3567_v47  ;;  %v3164_v47 = vld [vmem:[#allocation2 + $0x34] sm:$0xff]  }
 0x1a6   : > { %v1829_v16 = vpop.f32.mrf.mxu0  ;;  %v702_v60 = vrot.slane %v3164_v47, 1 }
 0x1a7   : > { %1877 = vmatmul.bf16.gmra.mxu1 %v701_v34  ;;  %1966 = vmatmul.bf16.gmra.mxu2 %v3163_v8  ;;  %v3841_v5 = vadd.f32 %v1826_v31, %v1738_v37 }
 0x1a8   : > { %2055 = vmatmul.bf16.gmra.mxu3 %v3589_v10  ;;  %v703_v10 = vsel %vm454_vm1, %v700_v11, %v702_v60 }
 0x1a9   : > { %2144 = vmatmul.bf16.gmra.mxu0 %v3592_v29 }
 0x1aa   : > { %v1651_v48 = vpop.f32.mrf.mxu2 }
 0x1ab   : > { %v1652_v44 = vadd.f32 %v1651_v48, %v1563_v36  ;;  %v1740_v0 = vpop.f32.mrf.mxu3 }
 0x1ac   : > { %v1564_v15 = vpop.f32.mrf.mxu1 }
 0x1ad   : > { %v1741_v1 = vadd.f32 %v1740_v0, %v1652_v44  ;;  %v1565_v21 = vadd.f32 %v1564_v15, %v3583_v19 }
 0x1ae   : > { %v1831_v2 = vpop.f32.mrf.mxu0 }
 0x1af   : > { %v3846_v38 = vadd.f32 %v1829_v16, %v1741_v1 }
 0x1b2   : > { %v1653_v30 = vpop.f32.mrf.mxu2 }
 0x1b3   : > { %v1654_v26 = vadd.f32 %v1653_v30, %v1565_v21  ;;  %v1742_v43 = vpop.f32.mrf.mxu3 }
 0x1b4   : > { %v1567_v14 = vpop.f32.mrf.mxu1 }
 0x1b5   : > { %v1743_v57 = vadd.f32 %v1742_v43, %v1654_v26  ;;  %v1568_v29 = vadd.f32 %v1567_v14, %v3606_v22  ;;  %v3166_v22 = vld [vmem:[#allocation2 + $0x3c] sm:$0xff]  }
 0x1b6   : > { %v1834_v31 = vpop.f32.mrf.mxu0  ;;  %v704_v16 = vrot.slane %v3166_v22, 1  ;;  %v3169_v22 = vld [vmem:[#allocation2 + $0x50] sm:$0xff]  }
 0x1b7   : > { %1882 = vmatmul.bf16.gmra.mxu1 %v703_v10  ;;  %1971 = vmatmul.bf16.gmra.mxu2 %v3165_v7  ;;  %v3850_v33 = vadd.f32 %v1831_v2, %v1743_v57  ;;  %v3167_v2 = vld [vmem:[#allocation2 + $0x48] sm:$0xff]   ;;  %v4069_v10 = vld [vmem:[#allocation16_spill] sm:$0xff] }
 0x1b8   : > { %2060 = vmatmul.bf16.gmra.mxu3 %v3630_v23  ;;  %v705_v23 = vsel %vm454_vm1, %v702_v60, %v704_v16 }
 0x1b9   : > { %2149 = vmatmul.bf16.gmra.mxu0 %v3633_v59  ;;  %v4068_v59 = vld [vmem:[#allocation15_spill] sm:$0xff] }
 0x1ba   : > { %v1656_v19 = vpop.f32.mrf.mxu2 }
 0x1bb   : > { %v1657_v50 = vadd.f32 %v1656_v19, %v1568_v29  ;;  %v1745_v12 = vpop.f32.mrf.mxu3 }
 0x1bc   : > { %v1569_v52 = vpop.f32.mrf.mxu1 }
 0x1bd   : > { %v1746_v34 = vadd.f32 %v1745_v12, %v1657_v50  ;;  %v1570_v11 = vadd.f32 %v1569_v52, %v3624_v42 }
 0x1be   : > { %v1836_v37 = vpop.f32.mrf.mxu0 }
 0x1bf   : > { %v3855_v36 = vadd.f32 %v1834_v31, %v1746_v34  ;;  %v3168_v31 = vld [vmem:[#allocation2 + $0x44] sm:$0xff]  }
 0x1c0   : > { %v706_v7 = vrot.slane %v3168_v31, 1  ;;  %v3170_v31 = vld [vmem:[#allocation2 + $0x58] sm:$0xff]  }
 0x1c2   : > { %v1658_v8 = vpop.f32.mrf.mxu2 }
 0x1c3   : > { %v1659_v48 = vadd.f32 %v1658_v8, %v1570_v11  ;;  %v1747_v44 = vpop.f32.mrf.mxu3 }
 0x1c4   : > { %v1572_v0 = vpop.f32.mrf.mxu1 }
 0x1c5   : > { %v1748_v15 = vadd.f32 %v1747_v44, %v1659_v48  ;;  %v1573_v1 = vadd.f32 %v1572_v0, %v4068_v59  ;;  %v4071_v59 = vld [vmem:[#allocation19_spill] sm:$0xff] }
 0x1c6   : > { %v1839_v21 = vpop.f32.mrf.mxu0 }
 0x1c7   : > { %1887 = vmatmul.bf16.gmra.mxu1 %v705_v23  ;;  %1976 = vmatmul.bf16.gmra.mxu2 %v3167_v2  ;;  %v3859_v47 = vadd.f32 %v1836_v37, %v1748_v15  ;;  %v4072_v2 = vld [vmem:[#allocation17_spill] sm:$0xff] }
 0x1c8   : > { %2065 = vmatmul.bf16.gmra.mxu3 %v3653_v32  ;;  %v707_v32 = vsel %vm454_vm1, %v704_v16, %v706_v7 }
 0x1c9   : > { %2154 = vmatmul.bf16.gmra.mxu0 %v3656_v28  ;;  %v4070_v28 = vld [vmem:[#allocation18_spill] sm:$0xff] }
 0x1ca   : > { %v1661_v42 = vpop.f32.mrf.mxu2 }
 0x1cb   : > { %v1662_v30 = vadd.f32 %v1661_v42, %v1573_v1  ;;  %v1750_v26 = vpop.f32.mrf.mxu3  ;;  %v708_v42 = vrot.slane %v4072_v2, 1  ;;  %v3171_v2 = vld [vmem:[#allocation2 + $0x60] sm:$0xff]  }
 0x1cc   : > { %v1574_v43 = vpop.f32.mrf.mxu1 }
 0x1cd   : > { %v1751_v14 = vadd.f32 %v1750_v26, %v1662_v30  ;;  %v1575_v60 = vadd.f32 %v1574_v43, %v4069_v10 }
 0x1ce   : > { %v1841_v57 = vpop.f32.mrf.mxu0 }
 0x1cf   : > { %v3864_v29 = vadd.f32 %v1839_v21, %v1751_v14 }
 0x1d2   : > { %v1663_v19 = vpop.f32.mrf.mxu2 }
 0x1d3   : > { %v1664_v50 = vadd.f32 %v1663_v19, %v1575_v60  ;;  %v1752_v12 = vpop.f32.mrf.mxu3 }
 0x1d4   : > { %v1577_v52 = vpop.f32.mrf.mxu1 }
 0x1d5   : > { %v1753_v34 = vadd.f32 %v1752_v12, %v1664_v50  ;;  %v1578_v11 = vadd.f32 %v1577_v52, %v4070_v28  ;;  %v4074_v28 = vld [vmem:[#allocation22_spill] sm:$0xff] }
 0x1d6   : > { %v1844_v37 = vpop.f32.mrf.mxu0 }
 0x1d7   : > { %1892 = vmatmul.bf16.gmra.mxu1 %v707_v32  ;;  %1981 = vmatmul.bf16.gmra.mxu2 %v3169_v22  ;;  %v3868_v8 = vadd.f32 %v1841_v57, %v1753_v34  ;;  %v4075_v22 = vld [vmem:[#allocation20_spill] sm:$0xff] }
 0x1d8   : > { %2070 = vmatmul.bf16.gmra.mxu3 %v3678_v18  ;;  %v709_v18 = vsel %vm454_vm1, %v706_v7, %v708_v42 }
 0x1d9   : > { %2159 = vmatmul.bf16.gmra.mxu0 %v3681_v25  ;;  %v4073_v25 = vld [vmem:[#allocation21_spill] sm:$0xff] }
 0x1da   : > { %v1666_v48 = vpop.f32.mrf.mxu2 }
 0x1db   : > { %v1667_v44 = vadd.f32 %v1666_v48, %v1578_v11  ;;  %v1755_v0 = vpop.f32.mrf.mxu3  ;;  %v710_v48 = vrot.slane %v4075_v22, 1 }
 0x1dc   : > { %v1579_v23 = vpop.f32.mrf.mxu1 }
 0x1dd   : > { %v1756_v15 = vadd.f32 %v1755_v0, %v1667_v44  ;;  %v1580_v16 = vadd.f32 %v1579_v23, %v4071_v59 }
 0x1de   : > { %v1846_v1 = vpop.f32.mrf.mxu0 }
 0x1df   : > { %v3873_v21 = vadd.f32 %v1844_v37, %v1756_v15 }
 0x1e2   : > { %v1668_v30 = vpop.f32.mrf.mxu2 }
 0x1e3   : > { %v1669_v26 = vadd.f32 %v1668_v30, %v1580_v16  ;;  %v1757_v43 = vpop.f32.mrf.mxu3 }
 0x1e4   : > { %v1582_v14 = vpop.f32.mrf.mxu1 }
 0x1e5   : > { %v1758_v10 = vadd.f32 %v1757_v43, %v1669_v26  ;;  %v1583_v60 = vadd.f32 %v1582_v14, %v4073_v25  ;;  %v4077_v25 = vld [vmem:[#allocation24_spill] sm:$0xff] }
 0x1e6   : > { %v1849_v57 = vpop.f32.mrf.mxu0 }
 0x1e7   : > { %1897 = vmatmul.bf16.gmra.mxu1 %v709_v18  ;;  %1986 = vmatmul.bf16.gmra.mxu2 %v3170_v31  ;;  %v3878_v19 = vadd.f32 %v1846_v1, %v1758_v10  ;;  %v712_v31 = vrot.slane %v3603_v41, 1 }
 0x1e8   : > { %2075 = vmatmul.bf16.gmra.mxu3 %v3705_v54  ;;  %v711_v54 = vsel %vm454_vm1, %v708_v42, %v710_v48 }
 0x1e9   : > { %2164 = vmatmul.bf16.gmra.mxu0 %v3708_v46  ;;  %v4076_v46 = vld [vmem:[#allocation23_spill] sm:$0xff] }
 0x1ea   : > { %v1671_v50 = vpop.f32.mrf.mxu2 }
 0x1eb   : > { %v1672_v12 = vadd.f32 %v1671_v50, %v1583_v60  ;;  %v1760_v52 = vpop.f32.mrf.mxu3 }
 0x1ec   : > { %v1584_v32 = vpop.f32.mrf.mxu1 }
 0x1ed   : > { %v1761_v34 = vadd.f32 %v1760_v52, %v1672_v12  ;;  %v1585_v7 = vadd.f32 %v1584_v32, %v4074_v28  ;;  %v3172_v28 = vld [vmem:[#allocation2 + $0x68] sm:$0xff]  }
 0x1ee   : > { %v1851_v11 = vpop.f32.mrf.mxu0 }
 0x1ef   : > { %v3883_v37 = vadd.f32 %v1849_v57, %v1761_v34 }
 0x1f2   : > { %v1673_v44 = vpop.f32.mrf.mxu2 }
 0x1f3   : > { %v1674_v0 = vadd.f32 %v1673_v44, %v1585_v7  ;;  %v1762_v23 = vpop.f32.mrf.mxu3 }
 0x1f4   : > { %v1587_v15 = vpop.f32.mrf.mxu1 }
 0x1f5   : > { %v1763_v59 = vadd.f32 %v1762_v23, %v1674_v0  ;;  %v1588_v16 = vadd.f32 %v1587_v15, %v4076_v46  ;;  %v4078_v15 = vld [vmem:[#allocation25_spill] sm:$0xff] }
 0x1f6   : > { %v1854_v1 = vpop.f32.mrf.mxu0 }
 0x1f7   : > { %1902 = vmatmul.bf16.gmra.mxu1 %v711_v54  ;;  %1991 = vmatmul.bf16.gmra.mxu2 %v3171_v2  ;;  %v3888_v30 = vadd.f32 %v1851_v11, %v1763_v59  ;;  %v4079_v59 = vld [vmem:[#allocation26_spill] sm:$0xff] }
 0x1f8   : > { %2080 = vmatmul.bf16.gmra.mxu3 %v3733_v27  ;;  %v713_v27 = vsel %vm454_vm1, %v710_v48, %v712_v31  ;;  %v714_v48 = vrot.slane %v4078_v15, 1 }
 0x1f9   : > { %2169 = vmatmul.bf16.gmra.mxu0 %v3736_v45 }
 0x1fa   : > { %v1676_v26 = vpop.f32.mrf.mxu2 }
 0x1fb   : > { %v1677_v43 = vadd.f32 %v1676_v26, %v1588_v16  ;;  %v1765_v14 = vpop.f32.mrf.mxu3 }
 0x1fc   : > { %v1589_v18 = vpop.f32.mrf.mxu1 }
 0x1fd   : > { %v1766_v10 = vadd.f32 %v1765_v14, %v1677_v43  ;;  %v1590_v42 = vadd.f32 %v1589_v18, %v4077_v25  ;;  %v3173_v18 = vld [vmem:[#allocation2 + $0x70] sm:$0xff]  }
 0x1fe   : > { %v1856_v60 = vpop.f32.mrf.mxu0 }
 0x1ff   : > { %v3893_v57 = vadd.f32 %v1854_v1, %v1766_v10 }
 0x202   : > { %v1678_v50 = vpop.f32.mrf.mxu2 }
 0x203   : > { %v1679_v12 = vadd.f32 %v1678_v50, %v1590_v42  ;;  %v1767_v52 = vpop.f32.mrf.mxu3  ;;  %v4080_v50 = vld [vmem:[#allocation28_spill] sm:$0xff] }
 0x204   : > { %v1868_v32 = vpop.f32.mrf.mxu1 }
 0x205   : > { %v1768_v34 = vadd.f32 %v1767_v52, %v1679_v12  ;;  %v1869_v41 = vadd.f32 %v1868_v32, %v3647_v4 }
 0x206   : > { %v2135_v45 = vpop.f32.mrf.mxu0 }
 0x207   : > { %1907 = vmatmul.bf16.gmra.mxu1 %v713_v27  ;;  %1996 = vmatmul.bf16.gmra.mxu2 %v3172_v28  ;;  %v3897_v7 = vadd.f32 %v1856_v60, %v1768_v34  ;;  %v766_v34 = vshll.u32 %v3700_v6, 16 }
 0x208   : > { %2085 = vmatmul.bf16.gmra.mxu3 %v3756_v9  ;;  %v715_v9 = vsel %vm454_vm1, %v712_v31, %v714_v48 }
 0x209   : > { %2174 = vmatmul.bf16.gmra.mxu0 %v3759_v35 }
 0x20a   : > { %v1957_v11 = vpop.f32.mrf.mxu2 }
 0x20b   : > { %v2046_v22 = vpop.f32.mrf.mxu3  ;;  %v1958_v0 = vadd.f32 %v1957_v11, %v1869_v41  ;;  %v4082_v41 = vld [vmem:[#allocation29_spill] sm:$0xff] }
 0x20c   : > { %v1870_v44 = vpop.f32.mrf.mxu1 }
 0x20d   : > { %v2047_v54 = vadd.f32 %v2046_v22, %v1958_v0  ;;  %v1871_v46 = vadd.f32 %v1870_v44, %v4079_v59  ;;  %v768_v22 = vrot.slane %v766_v34, 1 }
 0x20e   : > { %v2137_v23 = vpop.f32.mrf.mxu0 }
 0x20f   : > { %v2136_v43 = vadd.f32 %v2135_v45, %v2047_v54  ;;  %v4081_v45 = vld [vmem:[#allocation27_spill] sm:$0xff] }
 0x210   : > { %v716_v28 = vrot.slane %v4081_v45, 1 }
 0x211   : > { %v2215_v10 = vmax.f32 %v2136_v43, 0.0 }
 0x212   : > { %v1959_v16 = vpop.f32.mrf.mxu2  ;;  %v717_v54 = vsel %vm454_vm1, %v714_v48, %v716_v28  ;;  %v2955_v48 = vld [vmem:[#allocation2 + $0x88] sm:$0xff]  }
 0x213   : > { %v1960_v1 = vadd.f32 %v1959_v16, %v1871_v46  ;;  %v2048_v2 = vpop.f32.mrf.mxu3  ;;  %v818_v45 = vrot.slane %v2955_v48, 1 }
 0x214   : > { %v1873_v26 = vpop.f32.mrf.mxu1 }
 0x215   : > { %v2049_v35 = vadd.f32 %v2048_v2, %v1960_v1  ;;  %v1874_v12 = vadd.f32 %v1873_v26, %v4080_v50  ;;  %v769_v1 = vsel %vm305_vm0, %v3807_v53, %v768_v22  ;;  %v770_v53 = vshrl.u32 %v3700_v6, 16 }
 0x216   : > { %v2140_v14 = vpop.f32.mrf.mxu0  ;;  %v774_v50 = vshll.u32 %v2955_v48, 16 }
 0x217   : > { %v2138_v4 = vadd.f32 %v2137_v23, %v2049_v35  ;;  %1912 = vmatmul.bf16.gmra.mxu1 %v715_v9  ;;  %2001 = vmatmul.bf16.gmra.mxu2 %v3173_v18  ;;  %v3174_v9 = vld [vmem:[#allocation2 + $0x78] sm:$0xff]   ;;  %v4083_v18 = vld [vmem:[#allocation30_spill] sm:$0xff] }
 0x218   : > { %2090 = vmatmul.bf16.gmra.mxu3 %v3783_v63  ;;  %v776_v34 = vrot.slane %v774_v50, 1 }
 0x219   : > { %2179 = vmatmul.bf16.gmra.mxu0 %v3787_v20  ;;  %v2216_v25 = vmax.f32 %v2138_v4, 0.0  ;;  %v816_v20 = vrot.slane %v3700_v6, 1 }
 0x21a   : > { %v1962_v42 = vpop.f32.mrf.mxu2 }
 0x21b   : > { %v2863_v60 = vpack.c.bf16 %v2216_v25, %v2215_v10  ;;  %v2051_v52 = vpop.f32.mrf.mxu3  ;;  %v1963_v32 = vadd.f32 %v1962_v42, %v1874_v12  ;;  %v817_v2 = vsel %vm454_vm1, %v3778_v13, %v816_v20  ;;  %v718_v12 = vrot.slane %v3689_v39, 1 }
 0x21c   : > { %v1875_v31 = vpop.f32.mrf.mxu1  ;;  %v819_v39 = vsel %vm454_vm1, %v816_v20, %v818_v45  ;;  %v782_v20 = vshll.u32 %v3780_v56, 16 }
 0x21d   : > { %2864 = vst [vmem:[%s3396_s5] sm:$0xff] %v2863_v60   ;;  %v2052_v11 = vadd.f32 %v2051_v52, %v1963_v32  ;;  %v1876_v63 = vadd.f32 %v1875_v31, %v4082_v41  ;;  %v772_v52 = vor.u32 %v770_v53, %v768_v22  ;;  %v4084_v32 = vld [vmem:[#allocation31_spill] sm:$0xff] }
 0x21e   : > { %v2142_v27 = vpop.f32.mrf.mxu0  ;;  %v784_v53 = vrot.slane %v782_v20, 1 }
 0x21f   : > { %v2141_v59 = vadd.f32 %v2140_v14, %v2052_v11 }
 0x221   : > { %v2217_v43 = vmax.f32 %v2141_v59, 0.0  ;;  %v777_v59 = vsel %vm305_vm0, %v772_v52, %v776_v34 }
 0x222   : > { %v1964_v44 = vpop.f32.mrf.mxu2 }
 0x223   : > { %v1965_v0 = vadd.f32 %v1964_v44, %v1876_v63  ;;  %v2053_v23 = vpop.f32.mrf.mxu3 }
 0x224   : > { %v1878_v15 = vpop.f32.mrf.mxu1 }
 0x225   : > { %v2054_v46 = vadd.f32 %v2053_v23, %v1965_v0  ;;  %v1879_v10 = vadd.f32 %v1878_v15, %v4083_v18  ;;  %v719_v0 = vsel %vm454_vm1, %v716_v28, %v718_v12  ;;  %v720_v18 = vrot.slane %v3721_v40, 1 }
 0x226   : > { %v2145_v16 = vpop.f32.mrf.mxu0 }
 0x227   : > { %v2143_v26 = vadd.f32 %v2142_v27, %v2054_v46  ;;  %1917 = vmatmul.bf16.gmra.mxu1 %v717_v54  ;;  %2006 = vmatmul.bf16.gmra.mxu2 %v3174_v9  ;;  %v4085_v9 = vld [vmem:[#allocation32_spill] sm:$0xff] }
 0x228   : > { %2095 = vmatmul.bf16.gmra.mxu3 %v769_v1 }
 0x229   : > { %2184 = vmatmul.bf16.gmra.mxu0 %v817_v2  ;;  %v2218_v35 = vmax.f32 %v2143_v26, 0.0 }
 0x22a   : > { %v1967_v4 = vpop.f32.mrf.mxu2 }
 0x22b   : > { %v2868_v14 = vpack.c.bf16 %v2218_v35, %v2217_v43  ;;  %v2056_v25 = vpop.f32.mrf.mxu3  ;;  %v1968_v13 = vadd.f32 %v1967_v4, %v1879_v10  ;;  %v778_v35 = vshrl.u32 %v2955_v48, 16 }
 0x22c   : > { %v1880_v42 = vpop.f32.mrf.mxu1 }
 0x22d   : > { %3022 = vst [vmem:[%s3396_s5 + $0x8] sm:$0xff] %v2868_v14   ;;  %v2057_v31 = vadd.f32 %v2056_v25, %v1968_v13  ;;  %v1881_v27 = vadd.f32 %v1880_v42, %v4084_v32  ;;  %v780_v10 = vor.u32 %v778_v35, %v776_v34  ;;  %v4086_v25 = vld [vmem:[#allocation33_spill] sm:$0xff]  ;;  %v820_v13 = vrot.slane %v3780_v56, 1 }
 0x22e   : > { %v2147_v60 = vpop.f32.mrf.mxu0  ;;  %v721_v32 = vsel %vm454_vm1, %v718_v12, %v720_v18  ;;  %v4087_v12 = vld [vmem:[#allocation35_spill] sm:$0xff] }
 0x22f   : > { %v2146_v23 = vadd.f32 %v2145_v16, %v2057_v31  ;;  %v821_v40 = vsel %vm454_vm1, %v818_v45, %v820_v13 }
 0x231   : > { %v2219_v46 = vmax.f32 %v2146_v23, 0.0  ;;  %v3936_v23 = vld [vmem:[#allocation2 + $0x98] sm:$0xff] }
 0x232   : > { %v1969_v11 = vpop.f32.mrf.mxu2 }
 0x233   : > { %v1970_v41 = vadd.f32 %v1969_v11, %v1881_v27  ;;  %v2058_v63 = vpop.f32.mrf.mxu3 }
 0x234   : > { %v1883_v44 = vpop.f32.mrf.mxu1 }
 0x235   : > { %v2059_v15 = vadd.f32 %v2058_v63, %v1970_v41  ;;  %v1884_v28 = vadd.f32 %v1883_v44, %v4085_v9  ;;  %v785_v63 = vsel %vm305_vm0, %v780_v10, %v784_v53 }
 0x236   : > { %v2150_v54 = vpop.f32.mrf.mxu0 }
 0x237   : > { %v2148_v22 = vadd.f32 %v2147_v60, %v2059_v15  ;;  %1922 = vmatmul.bf16.gmra.mxu1 %v719_v0  ;;  %2011 = vmatmul.bf16.gmra.mxu2 %v3700_v6 }
 0x238   : > { %2100 = vmatmul.bf16.gmra.mxu3 %v777_v59 }
 0x239   : > { %2189 = vmatmul.bf16.gmra.mxu0 %v819_v39  ;;  %v2220_v1 = vmax.f32 %v2148_v22, 0.0 }
 0x23a   : > { %v1972_v2 = vpop.f32.mrf.mxu2 }
 0x23b   : > { %v2873_v26 = vpack.c.bf16 %v2220_v1, %v2219_v46  ;;  %v2061_v16 = vpop.f32.mrf.mxu3  ;;  %v1973_v4 = vadd.f32 %v1972_v2, %v1884_v28  ;;  %v786_v46 = vshrl.u32 %v3780_v56, 16  ;;  %v790_v2 = vshll.u32 %v3936_v23, 16 }
 0x23c   : > { %v1885_v43 = vpop.f32.mrf.mxu1 }
 0x23d   : > { %3023 = vst [vmem:[%s3396_s5 + $0x10] sm:$0xff] %v2873_v26   ;;  %v2062_v6 = vadd.f32 %v2061_v16, %v1973_v4  ;;  %v1886_v42 = vadd.f32 %v1885_v43, %v4086_v25  ;;  %v788_v9 = vor.u32 %v786_v46, %v784_v53  ;;  %v4089_v16 = vld [vmem:[#allocation36_spill] sm:$0xff]  ;;  %v792_v35 = vrot.slane %v790_v2, 1  ;;  %v205_v2 = vld [vmem:[#allocation2 + $0xa8] sm:$0xf] }
 0x23e   : > { %v2152_v14 = vpop.f32.mrf.mxu0  ;;  %v822_v4 = vrot.slane %v3936_v23, 1 }
 0x23f   : > { %v2151_v27 = vadd.f32 %v2150_v54, %v2062_v6 }
 0x241   : > { %v2221_v44 = vmax.f32 %v2151_v27, 0.0 }
 0x242   : > { %v1974_v60 = vpop.f32.mrf.mxu2 }
 0x243   : > { %v1975_v50 = vadd.f32 %v1974_v60, %v1886_v42  ;;  %v2063_v52 = vpop.f32.mrf.mxu3 }
 0x244   : > { %v1888_v31 = vpop.f32.mrf.mxu1 }
 0x245   : > { %v2064_v11 = vadd.f32 %v2063_v52, %v1975_v50  ;;  %v1889_v54 = vadd.f32 %v1888_v31, %v4087_v12  ;;  %v793_v52 = vsel %vm305_vm0, %v788_v9, %v792_v35  ;;  %v823_v31 = vsel %vm454_vm1, %v820_v13, %v822_v4 }
 0x246   : > { %v2155_v41 = vpop.f32.mrf.mxu0 }
 0x247   : > { %v2153_v34 = vadd.f32 %v2152_v14, %v2064_v11  ;;  %1927 = vmatmul.bf16.gmra.mxu1 %v721_v32  ;;  %2016 = vmatmul.bf16.gmra.mxu2 %v2955_v48  ;;  %v4088_v48 = vld [vmem:[#allocation34_spill] sm:$0xff] }
 0x248   : > { %2105 = vmatmul.bf16.gmra.mxu3 %v785_v63  ;;  %v722_v26 = vrot.slane %v4088_v48, 1  ;;  %v3949_v32 = vld [vmem:[#allocation2 + $0xa0] sm:$0xff] }
 0x249   : > { %2194 = vmatmul.bf16.gmra.mxu0 %v821_v40  ;;  %v2222_v0 = vmax.f32 %v2153_v34, 0.0  ;;  %v798_v13 = vshll.u32 %v3949_v32, 16 }
 0x24a   : > { %v1977_v15 = vpop.f32.mrf.mxu2  ;;  %v723_v25 = vsel %vm454_vm1, %v720_v18, %v722_v26 }
 0x24b   : > { %v2878_v59 = vpack.c.bf16 %v2222_v0, %v2221_v44  ;;  %v2066_v39 = vpop.f32.mrf.mxu3  ;;  %v1978_v1 = vadd.f32 %v1977_v15, %v1889_v54  ;;  %v794_v0 = vshrl.u32 %v3936_v23, 16  ;;  %v800_v54 = vrot.slane %v798_v13, 1 }
 0x24c   : > { %v1890_v22 = vpop.f32.mrf.mxu1 }
 0x24d   : > { %3024 = vst [vmem:[%s3396_s5 + $0x18] sm:$0xff] %v2878_v59   ;;  %v2067_v28 = vadd.f32 %v2066_v39, %v1978_v1  ;;  %v1891_v43 = vadd.f32 %v1890_v22, %v4089_v16  ;;  %v796_v12 = vor.u32 %v794_v0, %v792_v35  ;;  %v4091_v22 = vld [vmem:[#allocation38_spill] sm:$0xff]  ;;  %v824_v1 = vrot.slane %v3949_v32, 1 }
 0x24e   : > { %v2157_v45 = vpop.f32.mrf.mxu0  ;;  %v763_v35 = vunpack.c.l.b16 %v205_v2 }
 0x24f   : > { %v2156_v42 = vadd.f32 %v2155_v41, %v2067_v28  ;;  %v4090_v41 = vld [vmem:[#allocation37_spill] sm:$0xff] }
 0x251   : > { %v2223_v27 = vmax.f32 %v2156_v42, 0.0 }
 0x252   : > { %v1979_v14 = vpop.f32.mrf.mxu2 }
 0x253   : > { %v1980_v20 = vadd.f32 %v1979_v14, %v1891_v43  ;;  %v2068_v10 = vpop.f32.mrf.mxu3  ;;  %v801_v43 = vsel %vm305_vm0, %v796_v12, %v800_v54 }
 0x254   : > { %v1893_v6 = vpop.f32.mrf.mxu1 }
 0x255   : > { %v2069_v60 = vadd.f32 %v2068_v10, %v1980_v20  ;;  %v1894_v40 = vadd.f32 %v1893_v6, %v4090_v41 }
 0x256   : > { %v2160_v50 = vpop.f32.mrf.mxu0 }
 0x257   : > { %v2158_v53 = vadd.f32 %v2157_v45, %v2069_v60  ;;  %1932 = vmatmul.bf16.gmra.mxu1 %v723_v25  ;;  %2021 = vmatmul.bf16.gmra.mxu2 %v3780_v56  ;;  %v724_v56 = vrot.slane %v3768_v51, 1  ;;  %v825_v51 = vsel %vm454_vm1, %v822_v4, %v824_v1  ;;  %v764_v60 = vpack.c.b16 %v763_v35, %v763_v35 }
 0x258   : > { %2110 = vmatmul.bf16.gmra.mxu3 %v793_v52 }
 0x259   : > { %2199 = vmatmul.bf16.gmra.mxu0 %v823_v31  ;;  %v2224_v11 = vmax.f32 %v2158_v53, 0.0  ;;  %v725_v16 = vsel %vm454_vm1, %v722_v26, %v724_v56 }
 0x25a   : > { %v1982_v63 = vpop.f32.mrf.mxu2 }
 0x25b   : > { %v2883_v18 = vpack.c.bf16 %v2224_v11, %v2223_v27  ;;  %v2071_v34 = vpop.f32.mrf.mxu3  ;;  %v1983_v15 = vadd.f32 %v1982_v63, %v1894_v40  ;;  %v802_v27 = vshrl.u32 %v3949_v32, 16  ;;  %v806_v63 = vshll.u32 %v764_v60, 16 }
 0x25c   : > { %v1895_v44 = vpop.f32.mrf.mxu1 }
 0x25d   : > { %3025 = vst [vmem:[%s3396_s5 + $0x20] sm:$0xff] %v2883_v18   ;;  %v2072_v39 = vadd.f32 %v2071_v34, %v1983_v15  ;;  %v1896_v46 = vadd.f32 %v1895_v44, %v4091_v22  ;;  %v726_v18 = vrot.slane %v3799_v49, 1  ;;  %v808_v34 = vrot.slane %v806_v63, 1 }
 0x25e   : > { %v2162_v59 = vpop.f32.mrf.mxu0  ;;  %v826_v44 = vrot.slane %v764_v60, 1 }
 0x25f   : > { %v2161_v14 = vadd.f32 %v2160_v50, %v2072_v39 }
 0x260   : > { %v827_v49 = vsel %vm454_vm1, %v824_v1, %v826_v44 }
 0x261   : > { %v2225_v25 = vmax.f32 %v2161_v14, 0.0 }
 0x262   : > { %v1984_v45 = vpop.f32.mrf.mxu2 }
 0x263   : > { %v1985_v48 = vadd.f32 %v1984_v45, %v1896_v46  ;;  %v2073_v9 = vpop.f32.mrf.mxu3 }
 0x264   : > { %v1898_v28 = vpop.f32.mrf.mxu1 }
 0x265   : > { %v2074_v20 = vadd.f32 %v2073_v9, %v1985_v48  ;;  %v1899_v31 = vadd.f32 %v1898_v28, %v3805_v3 }
 0x266   : > { %v2165_v10 = vpop.f32.mrf.mxu0 }
 0x267   : > { %v2163_v6 = vadd.f32 %v2162_v59, %v2074_v20  ;;  %1937 = vmatmul.bf16.gmra.mxu1 %v725_v16  ;;  %2026 = vmatmul.bf16.gmra.mxu2 %v3936_v23  ;;  %v804_v23 = vor.u32 %v802_v27, %v800_v54  ;;  %v727_v59 = vsel %vm454_vm1, %v724_v56, %v726_v18 }
 0x268   : > { %2115 = vmatmul.bf16.gmra.mxu3 %v801_v43 }
 0x269   : > { %2204 = vmatmul.bf16.gmra.mxu0 %v825_v51  ;;  %v2226_v42 = vmax.f32 %v2163_v6, 0.0  ;;  %v809_v46 = vsel %vm305_vm0, %v804_v23, %v808_v34 }
 0x26a   : > { %v1987_v52 = vpop.f32.mrf.mxu2 }
 0x26b   : > { %v2888_v26 = vpack.c.bf16 %v2226_v42, %v2225_v25  ;;  %v2076_v50 = vpop.f32.mrf.mxu3  ;;  %v1988_v4 = vadd.f32 %v1987_v52, %v1899_v31 }
 0x26c   : > { %v1900_v53 = vpop.f32.mrf.mxu1 }
 0x26d   : > { %3026 = vst [vmem:[%s3396_s5 + $0x28] sm:$0xff] %v2888_v26   ;;  %v2077_v41 = vadd.f32 %v2076_v50, %v1988_v4  ;;  %v1901_v40 = vadd.f32 %v1900_v53, %v3815_v24 }
 0x26e   : > { %v2167_v11 = vpop.f32.mrf.mxu0 }
 0x26f   : > { %v2166_v12 = vadd.f32 %v2165_v10, %v2077_v41 }
 0x271   : > { %v2227_v24 = vmax.f32 %v2166_v12, 0.0 }
 0x272   : > { %v1989_v0 = vpop.f32.mrf.mxu2 }
 0x273   : > { %v1990_v13 = vadd.f32 %v1989_v0, %v1901_v40  ;;  %v2078_v15 = vpop.f32.mrf.mxu3 }
 0x274   : > { %v1903_v3 = vpop.f32.mrf.mxu1 }
 0x275   : > { %v2079_v39 = vadd.f32 %v2078_v15, %v1990_v13  ;;  %v1904_v56 = vadd.f32 %v1903_v3, %v3819_v17 }
 0x276   : > { %v2170_v22 = vpop.f32.mrf.mxu0 }
 0x277   : > { %v2168_v54 = vadd.f32 %v2167_v11, %v2079_v39  ;;  %1942 = vmatmul.bf16.gmra.mxu1 %v727_v59  ;;  %2031 = vmatmul.bf16.gmra.mxu2 %v3949_v32 }
 0x278   : > { %2120 = vmatmul.bf16.gmra.mxu3 %v809_v46 }
 0x279   : > { %2209 = vmatmul.bf16.gmra.mxu0 %v827_v49  ;;  %v2228_v45 = vmax.f32 %v2168_v54, 0.0 }
 0x27a   : > { %v1992_v2 = vpop.f32.mrf.mxu2 }
 0x27b   : > { %v2893_v48 = vpack.c.bf16 %v2228_v45, %v2227_v24  ;;  %v2081_v9 = vpop.f32.mrf.mxu3  ;;  %v1993_v16 = vadd.f32 %v1992_v2, %v1904_v56 }
 0x27c   : > { %v1905_v28 = vpop.f32.mrf.mxu1 }
 0x27d   : > { %3027 = vst [vmem:[%s3396_s5 + $0x30] sm:$0xff] %v2893_v48   ;;  %v2082_v14 = vadd.f32 %v2081_v9, %v1993_v16  ;;  %v1906_v1 = vadd.f32 %v1905_v28, %v3823_v61 }
 0x27e   : > { %v2172_v43 = vpop.f32.mrf.mxu0 }
 0x27f   : > { %v2171_v35 = vadd.f32 %v2170_v22, %v2082_v14 }
 0x281   : > { %v2229_v60 = vmax.f32 %v2171_v35, 0.0 }
 0x282   : > { %v1994_v20 = vpop.f32.mrf.mxu2 }
 0x283   : > { %v1995_v10 = vadd.f32 %v1994_v20, %v1906_v1  ;;  %v2083_v32 = vpop.f32.mrf.mxu3 }
 0x284   : > { %v1908_v51 = vpop.f32.mrf.mxu1 }
 0x285   : > { %v2084_v6 = vadd.f32 %v2083_v32, %v1995_v10  ;;  %v1909_v31 = vadd.f32 %v1908_v51, %v3828_v62 }
 0x286   : > { %v2175_v25 = vpop.f32.mrf.mxu0 }
 0x287   : > { %v2173_v42 = vadd.f32 %v2172_v43, %v2084_v6 }
 0x289   : > { %v2230_v52 = vmax.f32 %v2173_v42, 0.0 }
 0x28a   : > { %v1997_v17 = vpop.f32.mrf.mxu2 }
 0x28b   : > { %v2898_v26 = vpack.c.bf16 %v2230_v52, %v2229_v60  ;;  %v2086_v50 = vpop.f32.mrf.mxu3  ;;  %v1998_v27 = vadd.f32 %v1997_v17, %v1909_v31 }
 0x28c   : > { %v1910_v53 = vpop.f32.mrf.mxu1 }
 0x28d   : > { %3028 = vst [vmem:[%s3396_s5 + $0x38] sm:$0xff] %v2898_v26   ;;  %v2087_v4 = vadd.f32 %v2086_v50, %v1998_v27  ;;  %v1911_v11 = vadd.f32 %v1910_v53, %v3832_v58 }
 0x28e   : > { %v2177_v61 = vpop.f32.mrf.mxu0 }
 0x28f   : > { %v2176_v40 = vadd.f32 %v2175_v25, %v2087_v4 }
 0x291   : > { %v2231_v13 = vmax.f32 %v2176_v40, 0.0 }
 0x292   : > { %v1999_v63 = vpop.f32.mrf.mxu2 }
 0x293   : > { %v2000_v18 = vadd.f32 %v1999_v63, %v1911_v11  ;;  %v2088_v23 = vpop.f32.mrf.mxu3 }
 0x294   : > { %v1913_v41 = vpop.f32.mrf.mxu1 }
 0x295   : > { %v2089_v34 = vadd.f32 %v2088_v23, %v2000_v18  ;;  %v1914_v59 = vadd.f32 %v1913_v41, %v3837_v55 }
 0x296   : > { %v2180_v44 = vpop.f32.mrf.mxu0 }
 0x297   : > { %v2178_v0 = vadd.f32 %v2177_v61, %v2089_v34 }
 0x299   : > { %v2232_v15 = vmax.f32 %v2178_v0, 0.0 }
 0x29a   : > { %v2002_v62 = vpop.f32.mrf.mxu2 }
 0x29b   : > { %v2903_v3 = vpack.c.bf16 %v2232_v15, %v2231_v13  ;;  %v2091_v12 = vpop.f32.mrf.mxu3  ;;  %v2003_v22 = vadd.f32 %v2002_v62, %v1914_v59 }
 0x29c   : > { %v1915_v39 = vpop.f32.mrf.mxu1 }
 0x29d   : > { %3029 = vst [vmem:[%s3396_s5 + $0x40] sm:$0xff] %v2903_v3   ;;  %v2092_v46 = vadd.f32 %v2091_v12, %v2003_v22  ;;  %v1916_v49 = vadd.f32 %v1915_v39, %v3841_v5 }
 0x29e   : > { %v2182_v58 = vpop.f32.mrf.mxu0 }
 0x29f   : > { %v2181_v48 = vadd.f32 %v2180_v44, %v2092_v46 }
 0x2a1   : > { %v2233_v16 = vmax.f32 %v2181_v48, 0.0 }
 0x2a2   : > { %v2004_v54 = vpop.f32.mrf.mxu2 }
 0x2a3   : > { %v2005_v24 = vadd.f32 %v2004_v54, %v1916_v49  ;;  %v2093_v45 = vpop.f32.mrf.mxu3 }
 0x2a4   : > { %v1918_v2 = vpop.f32.mrf.mxu1 }
 0x2a5   : > { %v2094_v56 = vadd.f32 %v2093_v45, %v2005_v24  ;;  %v1919_v1 = vadd.f32 %v1918_v2, %v3846_v38 }
 0x2a6   : > { %v2185_v9 = vpop.f32.mrf.mxu0 }
 0x2a7   : > { %v2183_v28 = vadd.f32 %v2182_v58, %v2094_v56 }
 0x2a9   : > { %v2234_v43 = vmax.f32 %v2183_v28, 0.0 }
 0x2aa   : > { %v2007_v55 = vpop.f32.mrf.mxu2 }
 0x2ab   : > { %v2908_v14 = vpack.c.bf16 %v2234_v43, %v2233_v16  ;;  %v2096_v20 = vpop.f32.mrf.mxu3  ;;  %v2008_v32 = vadd.f32 %v2007_v55, %v1919_v1 }
 0x2ac   : > { %v1920_v10 = vpop.f32.mrf.mxu1 }
 0x2ad   : > { %3030 = vst [vmem:[%s3396_s5 + $0x48] sm:$0xff] %v2908_v14   ;;  %v2097_v51 = vadd.f32 %v2096_v20, %v2008_v32  ;;  %v1921_v35 = vadd.f32 %v1920_v10, %v3850_v33 }
 0x2ae   : > { %v2187_v5 = vpop.f32.mrf.mxu0 }
 0x2af   : > { %v2186_v52 = vadd.f32 %v2185_v9, %v2097_v51 }
 0x2b1   : > { %v2235_v50 = vmax.f32 %v2186_v52, 0.0 }
 0x2b2   : > { %v2009_v6 = vpop.f32.mrf.mxu2 }
 0x2b3   : > { %v2010_v25 = vadd.f32 %v2009_v6, %v1921_v35  ;;  %v2098_v42 = vpop.f32.mrf.mxu3 }
 0x2b4   : > { %v1923_v60 = vpop.f32.mrf.mxu1 }
 0x2b5   : > { %v2099_v17 = vadd.f32 %v2098_v42, %v2010_v25  ;;  %v1924_v61 = vadd.f32 %v1923_v60, %v3855_v36 }
 0x2b6   : > { %v2190_v26 = vpop.f32.mrf.mxu0 }
 0x2b7   : > { %v2188_v31 = vadd.f32 %v2187_v5, %v2099_v17 }
 0x2b9   : > { %v2236_v53 = vmax.f32 %v2188_v31, 0.0 }
 0x2ba   : > { %v2012_v38 = vpop.f32.mrf.mxu2 }
 0x2bb   : > { %v2913_v27 = vpack.c.bf16 %v2236_v53, %v2235_v50  ;;  %v2101_v4 = vpop.f32.mrf.mxu3  ;;  %v2013_v63 = vadd.f32 %v2012_v38, %v1924_v61 }
 0x2bc   : > { %v1925_v11 = vpop.f32.mrf.mxu1 }
 0x2bd   : > { %3031 = vst [vmem:[%s3396_s5 + $0x50] sm:$0xff] %v2913_v27   ;;  %v2102_v18 = vadd.f32 %v2101_v4, %v2013_v63  ;;  %v1926_v23 = vadd.f32 %v1925_v11, %v3859_v47 }
 0x2be   : > { %v2192_v33 = vpop.f32.mrf.mxu0 }
 0x2bf   : > { %v2191_v0 = vadd.f32 %v2190_v26, %v2102_v18 }
 0x2c1   : > { %v2237_v3 = vmax.f32 %v2191_v0, 0.0 }
 0x2c2   : > { %v2014_v41 = vpop.f32.mrf.mxu2 }
 0x2c3   : > { %v2015_v40 = vadd.f32 %v2014_v41, %v1926_v23  ;;  %v2103_v34 = vpop.f32.mrf.mxu3 }
 0x2c4   : > { %v1928_v44 = vpop.f32.mrf.mxu1 }
 0x2c5   : > { %v2104_v13 = vadd.f32 %v2103_v34, %v2015_v40  ;;  %v1929_v39 = vadd.f32 %v1928_v44, %v3864_v29 }
 0x2c6   : > { %v2195_v15 = vpop.f32.mrf.mxu0 }
 0x2c7   : > { %v2193_v62 = vadd.f32 %v2192_v33, %v2104_v13 }
 0x2c9   : > { %v2238_v59 = vmax.f32 %v2193_v62, 0.0 }
 0x2ca   : > { %v2017_v36 = vpop.f32.mrf.mxu2 }
 0x2cb   : > { %v2918_v12 = vpack.c.bf16 %v2238_v59, %v2237_v3  ;;  %v2106_v22 = vpop.f32.mrf.mxu3  ;;  %v2018_v46 = vadd.f32 %v2017_v36, %v1929_v39 }
 0x2cc   : > { %v1930_v58 = vpop.f32.mrf.mxu1 }
 0x2cd   : > { %3032 = vst [vmem:[%s3396_s5 + $0x58] sm:$0xff] %v2918_v12   ;;  %v2107_v49 = vadd.f32 %v2106_v22, %v2018_v46  ;;  %v1931_v54 = vadd.f32 %v1930_v58, %v3868_v8 }
 0x2ce   : > { %v2197_v47 = vpop.f32.mrf.mxu0 }
 0x2cf   : > { %v2196_v56 = vadd.f32 %v2195_v15, %v2107_v49 }
 0x2d1   : > { %v2239_v43 = vmax.f32 %v2196_v56, 0.0 }
 0x2d2   : > { %v2019_v24 = vpop.f32.mrf.mxu2 }
 0x2d3   : > { %v2020_v45 = vadd.f32 %v2019_v24, %v1931_v54  ;;  %v2108_v2 = vpop.f32.mrf.mxu3 }
 0x2d4   : > { %v1933_v48 = vpop.f32.mrf.mxu1 }
 0x2d5   : > { %v2109_v9 = vadd.f32 %v2108_v2, %v2020_v45  ;;  %v1934_v1 = vadd.f32 %v1933_v48, %v3873_v21 }
 0x2d6   : > { %v2200_v28 = vpop.f32.mrf.mxu0 }
 0x2d7   : > { %v2198_v16 = vadd.f32 %v2197_v47, %v2109_v9 }
 0x2d9   : > { %v2240_v55 = vmax.f32 %v2198_v16, 0.0 }
 0x2da   : > { %v2022_v29 = vpop.f32.mrf.mxu2 }
 0x2db   : > { %v2923_v14 = vpack.c.bf16 %v2240_v55, %v2239_v43  ;;  %v2111_v20 = vpop.f32.mrf.mxu3  ;;  %v2023_v32 = vadd.f32 %v2022_v29, %v1934_v1 }
 0x2dc   : > { %v1935_v10 = vpop.f32.mrf.mxu1 }
 0x2dd   : > { %3033 = vst [vmem:[%s3396_s5 + $0x60] sm:$0xff] %v2923_v14   ;;  %v2112_v5 = vadd.f32 %v2111_v20, %v2023_v32  ;;  %v1936_v51 = vadd.f32 %v1935_v10, %v3878_v19 }
 0x2de   : > { %v2202_v8 = vpop.f32.mrf.mxu0 }
 0x2df   : > { %v2201_v60 = vadd.f32 %v2200_v28, %v2112_v5 }
 0x2e1   : > { %v2241_v31 = vmax.f32 %v2201_v60, 0.0 }
 0x2e2   : > { %v2024_v35 = vpop.f32.mrf.mxu2 }
 0x2e3   : > { %v2025_v6 = vadd.f32 %v2024_v35, %v1936_v51  ;;  %v2113_v25 = vpop.f32.mrf.mxu3 }
 0x2e4   : > { %v1938_v42 = vpop.f32.mrf.mxu1 }
 0x2e5   : > { %v2114_v52 = vadd.f32 %v2113_v25, %v2025_v6  ;;  %v1939_v38 = vadd.f32 %v1938_v42, %v3883_v37 }
 0x2e6   : > { %v2205_v26 = vpop.f32.mrf.mxu0 }
 0x2e7   : > { %v2203_v17 = vadd.f32 %v2202_v8, %v2114_v52 }
 0x2e9   : > { %v2242_v50 = vmax.f32 %v2203_v17, 0.0 }
 0x2ea   : > { %v2027_v21 = vpop.f32.mrf.mxu2 }
 0x2eb   : > { %v2928_v53 = vpack.c.bf16 %v2242_v50, %v2241_v31  ;;  %v2116_v27 = vpop.f32.mrf.mxu3  ;;  %v2028_v4 = vadd.f32 %v2027_v21, %v1939_v38 }
 0x2ec   : > { %v1940_v61 = vpop.f32.mrf.mxu1 }
 0x2ed   : > { %3034 = vst [vmem:[%s3396_s5 + $0x68] sm:$0xff] %v2928_v53   ;;  %v2117_v19 = vadd.f32 %v2116_v27, %v2028_v4  ;;  %v1941_v11 = vadd.f32 %v1940_v61, %v3888_v30 }
 0x2ee   : > { %v2207_v63 = vpop.f32.mrf.mxu0 }
 0x2ef   : > { %v2206_v40 = vadd.f32 %v2205_v26, %v2117_v19 }
 0x2f1   : > { %v2243_v0 = vmax.f32 %v2206_v40, 0.0 }
 0x2f2   : > { %v2029_v33 = vpop.f32.mrf.mxu2 }
 0x2f3   : > { %v2030_v18 = vadd.f32 %v2029_v33, %v1941_v11  ;;  %v2118_v23 = vpop.f32.mrf.mxu3 }
 0x2f4   : > { %v1943_v41 = vpop.f32.mrf.mxu1 }
 0x2f5   : > { %v2119_v34 = vadd.f32 %v2118_v23, %v2030_v18  ;;  %v1944_v62 = vadd.f32 %v1943_v41, %v3893_v57 }
 0x2f6   : > { %v2210_v59 = vpop.f32.mrf.mxu0 }
 0x2f7   : > { %v2208_v44 = vadd.f32 %v2207_v63, %v2119_v34 }
 0x2f9   : > { %v2244_v13 = vmax.f32 %v2208_v44, 0.0 }
 0x2fa   : > { %v2032_v37 = vpop.f32.mrf.mxu2 }
 0x2fb   : > { %v2933_v15 = vpack.c.bf16 %v2244_v13, %v2243_v0  ;;  %v2121_v3 = vpop.f32.mrf.mxu3  ;;  %v2033_v30 = vadd.f32 %v2032_v37, %v1944_v62 }
 0x2fc   : > { %v1945_v36 = vpop.f32.mrf.mxu1 }
 0x2fd   : > { %3035 = vst [vmem:[%s3396_s5 + $0x70] sm:$0xff] %v2933_v15   ;;  %v2122_v12 = vadd.f32 %v2121_v3, %v2033_v30  ;;  %v1946_v39 = vadd.f32 %v1945_v36, %v3897_v7 }
 0x2fe   : > { %v2212_v49 = vpop.f32.mrf.mxu0 }
 0x2ff   : > { %v2211_v57 = vadd.f32 %v2210_v59, %v2122_v12 }
 0x301   : > { %v2245_v24 = vmax.f32 %v2211_v57, 0.0 }
 0x302   : > { %v2034_v22 = vpop.f32.mrf.mxu2 }
 0x303   : > { %v2035_v58 = vadd.f32 %v2034_v22, %v1946_v39  ;;  %v2123_v46 = vpop.f32.mrf.mxu3 }
 0x305   : > { %v2124_v47 = vadd.f32 %v2123_v46, %v2035_v58 }
 0x307   : > { %v2213_v54 = vadd.f32 %v2212_v49, %v2124_v47 }
 0x309   : > { %v2246_v45 = vmax.f32 %v2213_v54, 0.0 }
 0x30b   : > { %v2938_v7 = vpack.c.bf16 %v2246_v45, %v2245_v24 }
 0x30d   : > { %3036 = vst [vmem:[%s3396_s5 + $0x78] sm:$0xff] %v2938_v7  }
 0x30e   : > { %3256 = shalt.err (!%p3253_p12)
}
 0x30f   : > { %s3303_s4 = smov 64   ;;  %s3304_s30 = smov 4  }
 0x310   : > { %3105 = dma.vmem_to_hbm [thread:$0]  (%p3363_p5), %s2325_s17, 2048, %s2327_s19, %s2312_s16, %s3303_s4, %s3303_s4, %s3304_s30  }
 0x311 PF: > { %p3117_p13 = scmp.ge.s32.totalorder %s3297_s15, 2  ;;  %s2341_s5 = sand.u32 1, %s3285_s12  }
 0x312   : > { %s2342_s6 = scalar_lea.sflag [#allocation6], %s2341_s5 }
 0x313   : > { %p3112_p0 = pnand %p3117_p13, %p3367_p6 }
 0x315   : > { %p3113_p1 = pneg %p3112_p0 }
 0x317   : > { %3280 = dma.done.wait (%p3113_p1), %s2342_s6, 2048  }
 0x318   : > { %3282 = vsyncadd (%p3113_p1), %s2342_s6, 4294965248  ;;  %p14_p2 = scmp.ge.s32.totalorder %s3350_s18, 13   ;;  %s4092_s12 = smov %s3289_s13 }
 0x319   : > { %s4093_s13 = smov %s3293_s14  ;;  %s4094_s14 = smov %s3361_s21 }
 0x31a   : > { %s4095_s15 = smov %s3350_s18  ;;  %16 = sbr.rel (!%p14_p2) target bundleno = 4 (0x4), region = 70 }
 0x31f   :  { %2348 = vsyncpa [#allocation5], 1 }
 0x320   :  { %2350 = vsyncpa [#allocation5 + $0x1], 1 }
 0x321   :  { %2351 = vsyncpa [#allocation6], 1 }
 0x322   :  { %2353 = vsyncpa [#allocation6 + $0x1], 1 }
 0x323   :  { %2354 = vsyncmov [#allocation3] }
 0x326   :  { %s2355_s15 = vpop.sfrf %2354 }
 0x327   :  { %p2714_p5 = scmp.ne.s32.totalorder %s2355_s15, 0 }
 0x329   :  { %2359 = shalt.err (%p2714_p5)  }

</bundles_post_ra>
